<compile_context>
chip_gen: v7x
topology: tpu7x:2x2x1
jax: 0.10.0
libtpu: 0.0.40
codegen_flags: <defaults>
</compile_context>

<pallas_src>
import functools

import jax
import jax.numpy as jnp
from jax import lax
from jax.experimental import pallas as pl
from jax.experimental.pallas import tpu as pltpu

# Subpixel decomposition tables for ConvTranspose2d(k=4, s=2, p=1) on hp = zero-pad(h, 1):
#   output row 2*i+ph = sum_dh hp[i + _ROFF[ph] + dh] @ Wt[..., _KTAP[ph][dh], ...]   (same for cols)
_ROFF = (0, 1)
_KTAP = ((3, 1), (2, 0))


# ----------------------------- Pallas kernel ---------------------------------

def _make_unet_kernel(OH, OW, Cin, Cmid, Cout, compute_dtype):
    f32 = jnp.float32

    def kernel(xph_ref, w1_ref, b1_ref, wup_ref, bt_ref, y_ref, hp_ref):
        # ---- down: LeakyReLU(0.2) -> Conv2d(k=4,s=2,p=1) -> +b1 -> ReLU ----
        xall = xph_ref[0]                                # (4, OH+1, OW+1, Cin) stride-2 phases
        acc_h = jnp.zeros((OH * OW, Cmid), f32)
        for kh in range(4):
            for kw in range(4):
                p = (kh % 2) * 2 + (kw % 2)
                r, c = kh // 2, kw // 2
                tap = xall[p, r:r + OH, c:c + OW, :].astype(f32)
                tap = jnp.where(tap >= 0, tap, 0.2 * tap)          # fused LeakyReLU(0.2)
                a = tap.reshape(OH * OW, Cin).astype(compute_dtype)
                acc_h = acc_h + jnp.dot(a, w1_ref[kh * 4 + kw],
                                        preferred_element_type=f32)
        h = jnp.maximum(acc_h + b1_ref[...], 0.0)                  # bias + fused ReLU (uprelu)

        # ---- stage h (never written to HBM) into a zero-padded VMEM halo buffer ----
        hp_ref[...] = jnp.zeros_like(hp_ref)
        hp_ref[1:1 + OH, 1:1 + OW, :] = h.reshape(OH, OW, Cmid).astype(hp_ref.dtype)

        # ---- up: ConvTranspose2d(k=4,s=2,p=1) via subpixel phases (no dilation zeros) ----
        # columns [(ph*2+pw)*Cout : +Cout] of acc_y hold output phase (oh%2==ph, ow%2==pw)
        acc_y = jnp.zeros((OH * OW, 4 * Cout), f32)
        for rs in range(3):
            for cs in range(3):
                hs = hp_ref[rs:rs + OH, cs:cs + OW, :].reshape(OH * OW, Cmid)
                acc_y = acc_y + jnp.dot(hs, wup_ref[rs * 3 + cs],
                                        preferred_element_type=f32)
        y_ref[0] = (acc_y + bt_ref[...]).astype(y_ref.dtype)

    return kernel


def _unet_pallas_call(xph, w1_taps, b1_row, wup, bt_row, *,
                      OH, OW, Cin, Cmid, Cout, compute_dtype):
    B = xph.shape[0]
    OHp, OWp = OH + 1, OW + 1
    kernel = _make_unet_kernel(OH, OW, Cin, Cmid, Cout, compute_dtype)

    flops = 2 * B * OH * OW * (16 * Cin * Cmid + 9 * Cmid * 4 * Cout)
    bytes_accessed = int(
        sum(a.size * a.dtype.itemsize for a in (xph, w1_taps, b1_row, wup, bt_row))
        + B * OH * OW * 4 * Cout * 4)

    return pl.pallas_call(
        kernel,
        out_shape=jax.ShapeDtypeStruct((B, OH * OW, 4 * Cout), jnp.float32),
        grid_spec=pltpu.PrefetchScalarGridSpec(
            num_scalar_prefetch=0,
            grid=(B,),                                   # >= 2 parallel steps when B >= 2 (v7x: 2 TCs)
            in_specs=[
                pl.BlockSpec((1, 4, OHp, OWp, Cin), lambda b: (b, 0, 0, 0, 0)),
                pl.BlockSpec((16, Cin, Cmid), lambda b: (0, 0, 0)),
                pl.BlockSpec((1, Cmid), lambda b: (0, 0)),
                pl.BlockSpec((9, Cmid, 4 * Cout), lambda b: (0, 0, 0)),
                pl.BlockSpec((1, 4 * Cout), lambda b: (0, 0)),
            ],
            out_specs=pl.BlockSpec((1, OH * OW, 4 * Cout), lambda b: (b, 0, 0)),
            scratch_shapes=[pltpu.VMEM((OH + 2, OW + 2, Cmid), compute_dtype)],
        ),
        compiler_params=pltpu.CompilerParams(dimension_semantics=("parallel",)),
        cost_estimate=pl.CostEstimate(flops=flops, transcendentals=0,
                                      bytes_accessed=bytes_accessed),
    )(xph, w1_taps, b1_row, wup, bt_row)


# ------------------------------ UNetBlock forward ------------------------------

@functools.partial(jax.jit, static_argnames=("compute_dtype",))
def unet_block_forward(x_nchw, W1, b1, Wt, bt, *, compute_dtype=jnp.float32):
    """x: (B,Cin,H,W); W1: (Cmid,Cin,4,4) OIHW; Wt: (Cmid,Cout,4,4) IOHW -> (B, Cout+Cin, H, W)."""
    B, Cin, H, W = x_nchw.shape
    Cmid = W1.shape[0]
    Cout = Wt.shape[1]
    OH, OW = H // 2, W // 2

    # ---- layout plumbing (XLA side, ~1x input bytes; no 16x im2col in HBM) ----
    x_nhwc = jnp.transpose(x_nchw, (0, 2, 3, 1))
    xp = jnp.pad(x_nhwc, ((0, 0), (1, 1), (1, 1), (0, 0)))
    # stride-2 phase split: xph[b, 2*ph+pw, i, j, :] = xp[b, 2*i+ph, 2*j+pw, :]
    xph = jnp.stack([xp[:, ph::2, pw::2, :] for ph in range(2) for pw in range(2)],
                    axis=1).astype(compute_dtype)

    # Conv2d weight OIHW -> per-tap (Cin, Cmid) matrices, tap index = kh*4+kw
    w1_taps = jnp.transpose(W1, (2, 3, 1, 0)).reshape(16, Cin, Cmid).astype(compute_dtype)
    b1_row = b1.reshape(1, Cmid).astype(jnp.float32)

    # ConvTranspose2d weight -> 9 combined hp-slice weights (Cmid, 4*Cout), phase-packed columns.
    wup = jnp.zeros((9, Cmid, 4, Cout), Wt.dtype)
    for ph in range(2):
        for pw in range(2):
            for dh in range(2):
                for dw in range(2):
                    rs = _ROFF[ph] + dh
                    cs = _ROFF[pw] + dw
                    wtap = Wt[:, :, _KTAP[ph][dh], _KTAP[pw][dw]]        # (Cmid, Cout)
                    wup = wup.at[rs * 3 + cs, :, ph * 2 + pw, :].add(wtap)
    wup = wup.reshape(9, Cmid, 4 * Cout).astype(compute_dtype)
    bt_row = jnp.tile(bt.reshape(1, 1, Cout), (1, 4, 1)).reshape(1, 4 * Cout).astype(jnp.float32)

    y_packed = _unet_pallas_call(xph, w1_taps, b1_row, wup, bt_row,
                                 OH=OH, OW=OW, Cin=Cin, Cmid=Cmid, Cout=Cout,
                                 compute_dtype=compute_dtype)

    # unpack phases: (B, OH*OW, 4*Cout) -> (B, H, W, Cout) -> NCHW
    y = y_packed.reshape(B, OH, OW, 2, 2, Cout)
    y = jnp.transpose(y, (0, 1, 3, 2, 4, 5)).reshape(B, 2 * OH, 2 * OW, Cout)
    y_nchw = jnp.transpose(y, (0, 3, 1, 2))

    # innermost UNetBlock: torch.cat([model(x), x], dim=1)
    return jnp.concatenate([y_nchw, x_nchw], axis=1)


# ------------------------------ pure-JAX reference -----------------------------

def unet_block_reference(x, W1, b1, Wt, bt):
    h = jnp.where(x >= 0, x, 0.2 * x)
    h = lax.conv_general_dilated(
        h, W1, window_strides=(2, 2), padding=((1, 1), (1, 1)),
        dimension_numbers=("NCHW", "OIHW", "NCHW")) + b1[None, :, None, None]
    h = jnp.maximum(h, 0.0)
    Wt_flip = jnp.transpose(Wt[:, :, ::-1, ::-1], (1, 0, 2, 3))   # -> OIHW
    y = lax.conv_general_dilated(
        h, Wt_flip, window_strides=(1, 1), padding=((2, 2), (2, 2)),
        lhs_dilation=(2, 2),
        dimension_numbers=("NCHW", "OIHW", "NCHW")) + bt[None, :, None, None]
    return jnp.concatenate([y, x], axis=1)


# ----------------------------------- main --------------------------------------

if __name__ == "__main__":
    B, Cin, H, W = 2, 4, 16, 16
    Cmid, Cout = 8, 4            # inner_in_chan=8, out_chan=4, num_z=0

    key = jax.random.PRNGKey(0)
    kx, k1, k2, k3, k4 = jax.random.split(key, 5)
    x = jax.random.normal(kx, (B, Cin, H, W), jnp.float32)
    W1 = 0.1 * jax.random.normal(k1, (Cmid, Cin, 4, 4), jnp.float32)   # Conv2d (OIHW)
    b1 = 0.1 * jax.random.normal(k2, (Cmid,), jnp.float32)
    Wt = 0.1 * jax.random.normal(k3, (Cmid, Cout, 4, 4), jnp.float32)  # ConvTranspose2d (IOHW)
    bt = 0.1 * jax.random.normal(k4, (Cout,), jnp.float32)

    ref = unet_block_reference(x, W1, b1, Wt, bt)

    # f32 compute path: tight correctness check
    out_f32 = jax.block_until_ready(
        unet_block_forward(x, W1, b1, Wt, bt, compute_dtype=jnp.float32))
    assert out_f32.shape == (B, Cout + Cin, H, W), out_f32.shape
    assert jnp.allclose(out_f32, ref, atol=5e-4, rtol=5e-4), \
        float(jnp.max(jnp.abs(out_f32 - ref)))

    # bf16 compute path (halves HBM/VMEM bytes, MXU-native on v6e/v7x): loose check
    out_bf16 = jax.block_until_ready(
        unet_block_forward(x, W1, b1, Wt, bt, compute_dtype=jnp.bfloat16))
    assert out_bf16.shape == (B, Cout + Cin, H, W), out_bf16.shape
    assert jnp.allclose(out_bf16, ref, atol=1e-1, rtol=1e-1), \
        float(jnp.max(jnp.abs(out_bf16 - ref)))

    print("KERNEL_OK")
</pallas_src>

<mosaic_0001>
module attributes {stable_mosaic.version = 11 : i64} {
  func.func @kernel(%arg0: i32, %arg1: memref<1x4x9x9x4xf32, #tpu.memory_space<vmem>>, %arg2: memref<16x4x8xf32, #tpu.memory_space<vmem>>, %arg3: memref<1x8xf32, #tpu.memory_space<vmem>>, %arg4: memref<9x8x16xf32, #tpu.memory_space<vmem>>, %arg5: memref<1x16xf32, #tpu.memory_space<vmem>>, %arg6: memref<1x64x16xf32, #tpu.memory_space<vmem>>, %arg7: memref<10x10x8xf32, #tpu.memory_space<vmem>>) attributes {dimension_semantics = [#tpu.dimension_semantics<parallel>], iteration_bounds = array<i64: 2>, scalar_prefetch = 0 : i64, scratch_operands = 1 : i64, tpu.core_type = #tpu.core_type<tc>, window_params = [{transform_indices = @transform_0, window_bounds = array<i64: 1, 4, 9, 9, 4>}, {pipeline_mode = #tpu.pipeline_mode<synchronous>, transform_indices = @transform_1, window_bounds = array<i64: 16, 4, 8>}, {pipeline_mode = #tpu.pipeline_mode<synchronous>, transform_indices = @transform_2, window_bounds = array<i64: 1, 8>}, {pipeline_mode = #tpu.pipeline_mode<synchronous>, transform_indices = @transform_3, window_bounds = array<i64: 9, 8, 16>}, {pipeline_mode = #tpu.pipeline_mode<synchronous>, transform_indices = @transform_4, window_bounds = array<i64: 1, 16>}, {transform_indices = @transform_5, window_bounds = array<i64: 1, 64, 16>}]} {
    %c0 = arith.constant 0 : index
    %c0_0 = arith.constant 0 : index
    %c0_1 = arith.constant 0 : index
    %c0_2 = arith.constant 0 : index
    %c0_3 = arith.constant 0 : index
    %0 = vector.load %arg1[%c0, %c0_0, %c0_1, %c0_2, %c0_3] : memref<1x4x9x9x4xf32, #tpu.memory_space<vmem>>, vector<1x4x9x9x4xf32>
    %1 = vector.shape_cast %0 : vector<1x4x9x9x4xf32> to vector<4x9x9x4xf32>
    %cst = arith.constant 0.000000e+00 : f32
    %2 = vector.broadcast %cst : f32 to vector<64x8xf32>
    %3 = vector.extract_strided_slice %1 {offsets = [0, 0, 0, 0], sizes = [1, 8, 8, 4], strides = [1, 1, 1, 1]} : vector<4x9x9x4xf32> to vector<1x8x8x4xf32>
    %4 = vector.shape_cast %3 : vector<1x8x8x4xf32> to vector<8x8x4xf32>
    %cst_4 = arith.constant 0.000000e+00 : f32
    %5 = vector.broadcast %cst_4 : f32 to vector<8x8x4xf32>
    %6 = arith.cmpf oge, %4, %5 : vector<8x8x4xf32>
    %cst_5 = arith.constant 2.000000e-01 : f32
    %7 = vector.broadcast %cst_5 : f32 to vector<8x8x4xf32>
    %8 = arith.mulf %7, %4 : vector<8x8x4xf32>
    %9 = arith.select %6, %4, %8 : vector<8x8x4xi1>, vector<8x8x4xf32>
    %10 = vector.shape_cast %9 : vector<8x8x4xf32> to vector<64x4xf32>
    %c0_6 = arith.constant 0 : index
    %c0_7 = arith.constant 0 : index
    %c0_8 = arith.constant 0 : index
    %11 = vector.load %arg2[%c0_6, %c0_7, %c0_8] : memref<16x4x8xf32, #tpu.memory_space<vmem>>, vector<1x4x8xf32>
    %12 = vector.shape_cast %11 : vector<1x4x8xf32> to vector<4x8xf32>
    %cst_9 = arith.constant dense<0.000000e+00> : vector<64x8xf32>
    %13 = tpu.matmul %10, %12, %cst_9 {dimension_numbers = #tpu.dot_dimension_numbers<[1], [0], [0], [1], [0, 0, 1, 1], [], []>} : vector<64x4xf32>, vector<4x8xf32>, vector<64x8xf32> -> vector<64x8xf32>
    %14 = arith.addf %2, %13 : vector<64x8xf32>
    %15 = vector.extract_strided_slice %1 {offsets = [1, 0, 0, 0], sizes = [1, 8, 8, 4], strides = [1, 1, 1, 1]} : vector<4x9x9x4xf32> to vector<1x8x8x4xf32>
    %16 = vector.shape_cast %15 : vector<1x8x8x4xf32> to vector<8x8x4xf32>
    %cst_10 = arith.constant 0.000000e+00 : f32
    %17 = vector.broadcast %cst_10 : f32 to vector<8x8x4xf32>
    %18 = arith.cmpf oge, %16, %17 : vector<8x8x4xf32>
    %cst_11 = arith.constant 2.000000e-01 : f32
    %19 = vector.broadcast %cst_11 : f32 to vector<8x8x4xf32>
    %20 = arith.mulf %19, %16 : vector<8x8x4xf32>
    %21 = arith.select %18, %16, %20 : vector<8x8x4xi1>, vector<8x8x4xf32>
    %22 = vector.shape_cast %21 : vector<8x8x4xf32> to vector<64x4xf32>
    %c1 = arith.constant 1 : index
    %c0_12 = arith.constant 0 : index
    %c0_13 = arith.constant 0 : index
    %23 = vector.load %arg2[%c1, %c0_12, %c0_13] : memref<16x4x8xf32, #tpu.memory_space<vmem>>, vector<1x4x8xf32>
    %24 = vector.shape_cast %23 : vector<1x4x8xf32> to vector<4x8xf32>
    %cst_14 = arith.constant dense<0.000000e+00> : vector<64x8xf32>
    %25 = tpu.matmul %22, %24, %cst_14 {dimension_numbers = #tpu.dot_dimension_numbers<[1], [0], [0], [1], [0, 0, 1, 1], [], []>} : vector<64x4xf32>, vector<4x8xf32>, vector<64x8xf32> -> vector<64x8xf32>
    %26 = arith.addf %14, %25 : vector<64x8xf32>
    %27 = vector.extract_strided_slice %1 {offsets = [0, 0, 1, 0], sizes = [1, 8, 8, 4], strides = [1, 1, 1, 1]} : vector<4x9x9x4xf32> to vector<1x8x8x4xf32>
    %28 = vector.shape_cast %27 : vector<1x8x8x4xf32> to vector<8x8x4xf32>
    %cst_15 = arith.constant 0.000000e+00 : f32
    %29 = vector.broadcast %cst_15 : f32 to vector<8x8x4xf32>
    %30 = arith.cmpf oge, %28, %29 : vector<8x8x4xf32>
    %cst_16 = arith.constant 2.000000e-01 : f32
    %31 = vector.broadcast %cst_16 : f32 to vector<8x8x4xf32>
    %32 = arith.mulf %31, %28 : vector<8x8x4xf32>
    %33 = arith.select %30, %28, %32 : vector<8x8x4xi1>, vector<8x8x4xf32>
    %34 = vector.shape_cast %33 : vector<8x8x4xf32> to vector<64x4xf32>
    %c2 = arith.constant 2 : index
    %c0_17 = arith.constant 0 : index
    %c0_18 = arith.constant 0 : index
    %35 = vector.load %arg2[%c2, %c0_17, %c0_18] : memref<16x4x8xf32, #tpu.memory_space<vmem>>, vector<1x4x8xf32>
    %36 = vector.shape_cast %35 : vector<1x4x8xf32> to vector<4x8xf32>
    %cst_19 = arith.constant dense<0.000000e+00> : vector<64x8xf32>
    %37 = tpu.matmul %34, %36, %cst_19 {dimension_numbers = #tpu.dot_dimension_numbers<[1], [0], [0], [1], [0, 0, 1, 1], [], []>} : vector<64x4xf32>, vector<4x8xf32>, vector<64x8xf32> -> vector<64x8xf32>
    %38 = arith.addf %26, %37 : vector<64x8xf32>
    %39 = vector.extract_strided_slice %1 {offsets = [1, 0, 1, 0], sizes = [1, 8, 8, 4], strides = [1, 1, 1, 1]} : vector<4x9x9x4xf32> to vector<1x8x8x4xf32>
    %40 = vector.shape_cast %39 : vector<1x8x8x4xf32> to vector<8x8x4xf32>
    %cst_20 = arith.constant 0.000000e+00 : f32
    %41 = vector.broadcast %cst_20 : f32 to vector<8x8x4xf32>
    %42 = arith.cmpf oge, %40, %41 : vector<8x8x4xf32>
    %cst_21 = arith.constant 2.000000e-01 : f32
    %43 = vector.broadcast %cst_21 : f32 to vector<8x8x4xf32>
    %44 = arith.mulf %43, %40 : vector<8x8x4xf32>
    %45 = arith.select %42, %40, %44 : vector<8x8x4xi1>, vector<8x8x4xf32>
    %46 = vector.shape_cast %45 : vector<8x8x4xf32> to vector<64x4xf32>
    %c3 = arith.constant 3 : index
    %c0_22 = arith.constant 0 : index
    %c0_23 = arith.constant 0 : index
    %47 = vector.load %arg2[%c3, %c0_22, %c0_23] : memref<16x4x8xf32, #tpu.memory_space<vmem>>, vector<1x4x8xf32>
    %48 = vector.shape_cast %47 : vector<1x4x8xf32> to vector<4x8xf32>
    %cst_24 = arith.constant dense<0.000000e+00> : vector<64x8xf32>
    %49 = tpu.matmul %46, %48, %cst_24 {dimension_numbers = #tpu.dot_dimension_numbers<[1], [0], [0], [1], [0, 0, 1, 1], [], []>} : vector<64x4xf32>, vector<4x8xf32>, vector<64x8xf32> -> vector<64x8xf32>
    %50 = arith.addf %38, %49 : vector<64x8xf32>
    %51 = vector.extract_strided_slice %1 {offsets = [2, 0, 0, 0], sizes = [1, 8, 8, 4], strides = [1, 1, 1, 1]} : vector<4x9x9x4xf32> to vector<1x8x8x4xf32>
    %52 = vector.shape_cast %51 : vector<1x8x8x4xf32> to vector<8x8x4xf32>
    %cst_25 = arith.constant 0.000000e+00 : f32
    %53 = vector.broadcast %cst_25 : f32 to vector<8x8x4xf32>
    %54 = arith.cmpf oge, %52, %53 : vector<8x8x4xf32>
    %cst_26 = arith.constant 2.000000e-01 : f32
    %55 = vector.broadcast %cst_26 : f32 to vector<8x8x4xf32>
    %56 = arith.mulf %55, %52 : vector<8x8x4xf32>
    %57 = arith.select %54, %52, %56 : vector<8x8x4xi1>, vector<8x8x4xf32>
    %58 = vector.shape_cast %57 : vector<8x8x4xf32> to vector<64x4xf32>
    %c4 = arith.constant 4 : index
    %c0_27 = arith.constant 0 : index
    %c0_28 = arith.constant 0 : index
    %59 = vector.load %arg2[%c4, %c0_27, %c0_28] : memref<16x4x8xf32, #tpu.memory_space<vmem>>, vector<1x4x8xf32>
    %60 = vector.shape_cast %59 : vector<1x4x8xf32> to vector<4x8xf32>
    %cst_29 = arith.constant dense<0.000000e+00> : vector<64x8xf32>
    %61 = tpu.matmul %58, %60, %cst_29 {dimension_numbers = #tpu.dot_dimension_numbers<[1], [0], [0], [1], [0, 0, 1, 1], [], []>} : vector<64x4xf32>, vector<4x8xf32>, vector<64x8xf32> -> vector<64x8xf32>
    %62 = arith.addf %50, %61 : vector<64x8xf32>
    %63 = vector.extract_strided_slice %1 {offsets = [3, 0, 0, 0], sizes = [1, 8, 8, 4], strides = [1, 1, 1, 1]} : vector<4x9x9x4xf32> to vector<1x8x8x4xf32>
    %64 = vector.shape_cast %63 : vector<1x8x8x4xf32> to vector<8x8x4xf32>
    %cst_30 = arith.constant 0.000000e+00 : f32
    %65 = vector.broadcast %cst_30 : f32 to vector<8x8x4xf32>
    %66 = arith.cmpf oge, %64, %65 : vector<8x8x4xf32>
    %cst_31 = arith.constant 2.000000e-01 : f32
    %67 = vector.broadcast %cst_31 : f32 to vector<8x8x4xf32>
    %68 = arith.mulf %67, %64 : vector<8x8x4xf32>
    %69 = arith.select %66, %64, %68 : vector<8x8x4xi1>, vector<8x8x4xf32>
    %70 = vector.shape_cast %69 : vector<8x8x4xf32> to vector<64x4xf32>
    %c5 = arith.constant 5 : index
    %c0_32 = arith.constant 0 : index
    %c0_33 = arith.constant 0 : index
    %71 = vector.load %arg2[%c5, %c0_32, %c0_33] : memref<16x4x8xf32, #tpu.memory_space<vmem>>, vector<1x4x8xf32>
    %72 = vector.shape_cast %71 : vector<1x4x8xf32> to vector<4x8xf32>
    %cst_34 = arith.constant dense<0.000000e+00> : vector<64x8xf32>
    %73 = tpu.matmul %70, %72, %cst_34 {dimension_numbers = #tpu.dot_dimension_numbers<[1], [0], [0], [1], [0, 0, 1, 1], [], []>} : vector<64x4xf32>, vector<4x8xf32>, vector<64x8xf32> -> vector<64x8xf32>
    %74 = arith.addf %62, %73 : vector<64x8xf32>
    %75 = vector.extract_strided_slice %1 {offsets = [2, 0, 1, 0], sizes = [1, 8, 8, 4], strides = [1, 1, 1, 1]} : vector<4x9x9x4xf32> to vector<1x8x8x4xf32>
    %76 = vector.shape_cast %75 : vector<1x8x8x4xf32> to vector<8x8x4xf32>
    %cst_35 = arith.constant 0.000000e+00 : f32
    %77 = vector.broadcast %cst_35 : f32 to vector<8x8x4xf32>
    %78 = arith.cmpf oge, %76, %77 : vector<8x8x4xf32>
    %cst_36 = arith.constant 2.000000e-01 : f32
    %79 = vector.broadcast %cst_36 : f32 to vector<8x8x4xf32>
    %80 = arith.mulf %79, %76 : vector<8x8x4xf32>
    %81 = arith.select %78, %76, %80 : vector<8x8x4xi1>, vector<8x8x4xf32>
    %82 = vector.shape_cast %81 : vector<8x8x4xf32> to vector<64x4xf32>
    %c6 = arith.constant 6 : index
    %c0_37 = arith.constant 0 : index
    %c0_38 = arith.constant 0 : index
    %83 = vector.load %arg2[%c6, %c0_37, %c0_38] : memref<16x4x8xf32, #tpu.memory_space<vmem>>, vector<1x4x8xf32>
    %84 = vector.shape_cast %83 : vector<1x4x8xf32> to vector<4x8xf32>
    %cst_39 = arith.constant dense<0.000000e+00> : vector<64x8xf32>
    %85 = tpu.matmul %82, %84, %cst_39 {dimension_numbers = #tpu.dot_dimension_numbers<[1], [0], [0], [1], [0, 0, 1, 1], [], []>} : vector<64x4xf32>, vector<4x8xf32>, vector<64x8xf32> -> vector<64x8xf32>
    %86 = arith.addf %74, %85 : vector<64x8xf32>
    %87 = vector.extract_strided_slice %1 {offsets = [3, 0, 1, 0], sizes = [1, 8, 8, 4], strides = [1, 1, 1, 1]} : vector<4x9x9x4xf32> to vector<1x8x8x4xf32>
    %88 = vector.shape_cast %87 : vector<1x8x8x4xf32> to vector<8x8x4xf32>
    %cst_40 = arith.constant 0.000000e+00 : f32
    %89 = vector.broadcast %cst_40 : f32 to vector<8x8x4xf32>
    %90 = arith.cmpf oge, %88, %89 : vector<8x8x4xf32>
    %cst_41 = arith.constant 2.000000e-01 : f32
    %91 = vector.broadcast %cst_41 : f32 to vector<8x8x4xf32>
    %92 = arith.mulf %91, %88 : vector<8x8x4xf32>
    %93 = arith.select %90, %88, %92 : vector<8x8x4xi1>, vector<8x8x4xf32>
    %94 = vector.shape_cast %93 : vector<8x8x4xf32> to vector<64x4xf32>
    %c7 = arith.constant 7 : index
    %c0_42 = arith.constant 0 : index
    %c0_43 = arith.constant 0 : index
    %95 = vector.load %arg2[%c7, %c0_42, %c0_43] : memref<16x4x8xf32, #tpu.memory_space<vmem>>, vector<1x4x8xf32>
    %96 = vector.shape_cast %95 : vector<1x4x8xf32> to vector<4x8xf32>
    %cst_44 = arith.constant dense<0.000000e+00> : vector<64x8xf32>
    %97 = tpu.matmul %94, %96, %cst_44 {dimension_numbers = #tpu.dot_dimension_numbers<[1], [0], [0], [1], [0, 0, 1, 1], [], []>} : vector<64x4xf32>, vector<4x8xf32>, vector<64x8xf32> -> vector<64x8xf32>
    %98 = arith.addf %86, %97 : vector<64x8xf32>
    %99 = vector.extract_strided_slice %1 {offsets = [0, 1, 0, 0], sizes = [1, 8, 8, 4], strides = [1, 1, 1, 1]} : vector<4x9x9x4xf32> to vector<1x8x8x4xf32>
    %100 = vector.shape_cast %99 : vector<1x8x8x4xf32> to vector<8x8x4xf32>
    %cst_45 = arith.constant 0.000000e+00 : f32
    %101 = vector.broadcast %cst_45 : f32 to vector<8x8x4xf32>
    %102 = arith.cmpf oge, %100, %101 : vector<8x8x4xf32>
    %cst_46 = arith.constant 2.000000e-01 : f32
    %103 = vector.broadcast %cst_46 : f32 to vector<8x8x4xf32>
    %104 = arith.mulf %103, %100 : vector<8x8x4xf32>
    %105 = arith.select %102, %100, %104 : vector<8x8x4xi1>, vector<8x8x4xf32>
    %106 = vector.shape_cast %105 : vector<8x8x4xf32> to vector<64x4xf32>
    %c8 = arith.constant 8 : index
    %c0_47 = arith.constant 0 : index
    %c0_48 = arith.constant 0 : index
    %107 = vector.load %arg2[%c8, %c0_47, %c0_48] : memref<16x4x8xf32, #tpu.memory_space<vmem>>, vector<1x4x8xf32>
    %108 = vector.shape_cast %107 : vector<1x4x8xf32> to vector<4x8xf32>
    %cst_49 = arith.constant dense<0.000000e+00> : vector<64x8xf32>
    %109 = tpu.matmul %106, %108, %cst_49 {dimension_numbers = #tpu.dot_dimension_numbers<[1], [0], [0], [1], [0, 0, 1, 1], [], []>} : vector<64x4xf32>, vector<4x8xf32>, vector<64x8xf32> -> vector<64x8xf32>
    %110 = arith.addf %98, %109 : vector<64x8xf32>
    %111 = vector.extract_strided_slice %1 {offsets = [1, 1, 0, 0], sizes = [1, 8, 8, 4], strides = [1, 1, 1, 1]} : vector<4x9x9x4xf32> to vector<1x8x8x4xf32>
    %112 = vector.shape_cast %111 : vector<1x8x8x4xf32> to vector<8x8x4xf32>
    %cst_50 = arith.constant 0.000000e+00 : f32
    %113 = vector.broadcast %cst_50 : f32 to vector<8x8x4xf32>
    %114 = arith.cmpf oge, %112, %113 : vector<8x8x4xf32>
    %cst_51 = arith.constant 2.000000e-01 : f32
    %115 = vector.broadcast %cst_51 : f32 to vector<8x8x4xf32>
    %116 = arith.mulf %115, %112 : vector<8x8x4xf32>
    %117 = arith.select %114, %112, %116 : vector<8x8x4xi1>, vector<8x8x4xf32>
    %118 = vector.shape_cast %117 : vector<8x8x4xf32> to vector<64x4xf32>
    %c9 = arith.constant 9 : index
    %c0_52 = arith.constant 0 : index
    %c0_53 = arith.constant 0 : index
    %119 = vector.load %arg2[%c9, %c0_52, %c0_53] : memref<16x4x8xf32, #tpu.memory_space<vmem>>, vector<1x4x8xf32>
    %120 = vector.shape_cast %119 : vector<1x4x8xf32> to vector<4x8xf32>
    %cst_54 = arith.constant dense<0.000000e+00> : vector<64x8xf32>
    %121 = tpu.matmul %118, %120, %cst_54 {dimension_numbers = #tpu.dot_dimension_numbers<[1], [0], [0], [1], [0, 0, 1, 1], [], []>} : vector<64x4xf32>, vector<4x8xf32>, vector<64x8xf32> -> vector<64x8xf32>
    %122 = arith.addf %110, %121 : vector<64x8xf32>
    %123 = vector.extract_strided_slice %1 {offsets = [0, 1, 1, 0], sizes = [1, 8, 8, 4], strides = [1, 1, 1, 1]} : vector<4x9x9x4xf32> to vector<1x8x8x4xf32>
    %124 = vector.shape_cast %123 : vector<1x8x8x4xf32> to vector<8x8x4xf32>
    %cst_55 = arith.constant 0.000000e+00 : f32
    %125 = vector.broadcast %cst_55 : f32 to vector<8x8x4xf32>
    %126 = arith.cmpf oge, %124, %125 : vector<8x8x4xf32>
    %cst_56 = arith.constant 2.000000e-01 : f32
    %127 = vector.broadcast %cst_56 : f32 to vector<8x8x4xf32>
    %128 = arith.mulf %127, %124 : vector<8x8x4xf32>
    %129 = arith.select %126, %124, %128 : vector<8x8x4xi1>, vector<8x8x4xf32>
    %130 = vector.shape_cast %129 : vector<8x8x4xf32> to vector<64x4xf32>
    %c10 = arith.constant 10 : index
    %c0_57 = arith.constant 0 : index
    %c0_58 = arith.constant 0 : index
    %131 = vector.load %arg2[%c10, %c0_57, %c0_58] : memref<16x4x8xf32, #tpu.memory_space<vmem>>, vector<1x4x8xf32>
    %132 = vector.shape_cast %131 : vector<1x4x8xf32> to vector<4x8xf32>
    %cst_59 = arith.constant dense<0.000000e+00> : vector<64x8xf32>
    %133 = tpu.matmul %130, %132, %cst_59 {dimension_numbers = #tpu.dot_dimension_numbers<[1], [0], [0], [1], [0, 0, 1, 1], [], []>} : vector<64x4xf32>, vector<4x8xf32>, vector<64x8xf32> -> vector<64x8xf32>
    %134 = arith.addf %122, %133 : vector<64x8xf32>
    %135 = vector.extract_strided_slice %1 {offsets = [1, 1, 1, 0], sizes = [1, 8, 8, 4], strides = [1, 1, 1, 1]} : vector<4x9x9x4xf32> to vector<1x8x8x4xf32>
    %136 = vector.shape_cast %135 : vector<1x8x8x4xf32> to vector<8x8x4xf32>
    %cst_60 = arith.constant 0.000000e+00 : f32
    %137 = vector.broadcast %cst_60 : f32 to vector<8x8x4xf32>
    %138 = arith.cmpf oge, %136, %137 : vector<8x8x4xf32>
    %cst_61 = arith.constant 2.000000e-01 : f32
    %139 = vector.broadcast %cst_61 : f32 to vector<8x8x4xf32>
    %140 = arith.mulf %139, %136 : vector<8x8x4xf32>
    %141 = arith.select %138, %136, %140 : vector<8x8x4xi1>, vector<8x8x4xf32>
    %142 = vector.shape_cast %141 : vector<8x8x4xf32> to vector<64x4xf32>
    %c11 = arith.constant 11 : index
    %c0_62 = arith.constant 0 : index
    %c0_63 = arith.constant 0 : index
    %143 = vector.load %arg2[%c11, %c0_62, %c0_63] : memref<16x4x8xf32, #tpu.memory_space<vmem>>, vector<1x4x8xf32>
    %144 = vector.shape_cast %143 : vector<1x4x8xf32> to vector<4x8xf32>
    %cst_64 = arith.constant dense<0.000000e+00> : vector<64x8xf32>
    %145 = tpu.matmul %142, %144, %cst_64 {dimension_numbers = #tpu.dot_dimension_numbers<[1], [0], [0], [1], [0, 0, 1, 1], [], []>} : vector<64x4xf32>, vector<4x8xf32>, vector<64x8xf32> -> vector<64x8xf32>
    %146 = arith.addf %134, %145 : vector<64x8xf32>
    %147 = vector.extract_strided_slice %1 {offsets = [2, 1, 0, 0], sizes = [1, 8, 8, 4], strides = [1, 1, 1, 1]} : vector<4x9x9x4xf32> to vector<1x8x8x4xf32>
    %148 = vector.shape_cast %147 : vector<1x8x8x4xf32> to vector<8x8x4xf32>
    %cst_65 = arith.constant 0.000000e+00 : f32
    %149 = vector.broadcast %cst_65 : f32 to vector<8x8x4xf32>
    %150 = arith.cmpf oge, %148, %149 : vector<8x8x4xf32>
    %cst_66 = arith.constant 2.000000e-01 : f32
    %151 = vector.broadcast %cst_66 : f32 to vector<8x8x4xf32>
    %152 = arith.mulf %151, %148 : vector<8x8x4xf32>
    %153 = arith.select %150, %148, %152 : vector<8x8x4xi1>, vector<8x8x4xf32>
    %154 = vector.shape_cast %153 : vector<8x8x4xf32> to vector<64x4xf32>
    %c12 = arith.constant 12 : index
    %c0_67 = arith.constant 0 : index
    %c0_68 = arith.constant 0 : index
    %155 = vector.load %arg2[%c12, %c0_67, %c0_68] : memref<16x4x8xf32, #tpu.memory_space<vmem>>, vector<1x4x8xf32>
    %156 = vector.shape_cast %155 : vector<1x4x8xf32> to vector<4x8xf32>
    %cst_69 = arith.constant dense<0.000000e+00> : vector<64x8xf32>
    %157 = tpu.matmul %154, %156, %cst_69 {dimension_numbers = #tpu.dot_dimension_numbers<[1], [0], [0], [1], [0, 0, 1, 1], [], []>} : vector<64x4xf32>, vector<4x8xf32>, vector<64x8xf32> -> vector<64x8xf32>
    %158 = arith.addf %146, %157 : vector<64x8xf32>
    %159 = vector.extract_strided_slice %1 {offsets = [3, 1, 0, 0], sizes = [1, 8, 8, 4], strides = [1, 1, 1, 1]} : vector<4x9x9x4xf32> to vector<1x8x8x4xf32>
    %160 = vector.shape_cast %159 : vector<1x8x8x4xf32> to vector<8x8x4xf32>
    %cst_70 = arith.constant 0.000000e+00 : f32
    %161 = vector.broadcast %cst_70 : f32 to vector<8x8x4xf32>
    %162 = arith.cmpf oge, %160, %161 : vector<8x8x4xf32>
    %cst_71 = arith.constant 2.000000e-01 : f32
    %163 = vector.broadcast %cst_71 : f32 to vector<8x8x4xf32>
    %164 = arith.mulf %163, %160 : vector<8x8x4xf32>
    %165 = arith.select %162, %160, %164 : vector<8x8x4xi1>, vector<8x8x4xf32>
    %166 = vector.shape_cast %165 : vector<8x8x4xf32> to vector<64x4xf32>
    %c13 = arith.constant 13 : index
    %c0_72 = arith.constant 0 : index
    %c0_73 = arith.constant 0 : index
    %167 = vector.load %arg2[%c13, %c0_72, %c0_73] : memref<16x4x8xf32, #tpu.memory_space<vmem>>, vector<1x4x8xf32>
    %168 = vector.shape_cast %167 : vector<1x4x8xf32> to vector<4x8xf32>
    %cst_74 = arith.constant dense<0.000000e+00> : vector<64x8xf32>
    %169 = tpu.matmul %166, %168, %cst_74 {dimension_numbers = #tpu.dot_dimension_numbers<[1], [0], [0], [1], [0, 0, 1, 1], [], []>} : vector<64x4xf32>, vector<4x8xf32>, vector<64x8xf32> -> vector<64x8xf32>
    %170 = arith.addf %158, %169 : vector<64x8xf32>
    %171 = vector.extract_strided_slice %1 {offsets = [2, 1, 1, 0], sizes = [1, 8, 8, 4], strides = [1, 1, 1, 1]} : vector<4x9x9x4xf32> to vector<1x8x8x4xf32>
    %172 = vector.shape_cast %171 : vector<1x8x8x4xf32> to vector<8x8x4xf32>
    %cst_75 = arith.constant 0.000000e+00 : f32
    %173 = vector.broadcast %cst_75 : f32 to vector<8x8x4xf32>
    %174 = arith.cmpf oge, %172, %173 : vector<8x8x4xf32>
    %cst_76 = arith.constant 2.000000e-01 : f32
    %175 = vector.broadcast %cst_76 : f32 to vector<8x8x4xf32>
    %176 = arith.mulf %175, %172 : vector<8x8x4xf32>
    %177 = arith.select %174, %172, %176 : vector<8x8x4xi1>, vector<8x8x4xf32>
    %178 = vector.shape_cast %177 : vector<8x8x4xf32> to vector<64x4xf32>
    %c14 = arith.constant 14 : index
    %c0_77 = arith.constant 0 : index
    %c0_78 = arith.constant 0 : index
    %179 = vector.load %arg2[%c14, %c0_77, %c0_78] : memref<16x4x8xf32, #tpu.memory_space<vmem>>, vector<1x4x8xf32>
    %180 = vector.shape_cast %179 : vector<1x4x8xf32> to vector<4x8xf32>
    %cst_79 = arith.constant dense<0.000000e+00> : vector<64x8xf32>
    %181 = tpu.matmul %178, %180, %cst_79 {dimension_numbers = #tpu.dot_dimension_numbers<[1], [0], [0], [1], [0, 0, 1, 1], [], []>} : vector<64x4xf32>, vector<4x8xf32>, vector<64x8xf32> -> vector<64x8xf32>
    %182 = arith.addf %170, %181 : vector<64x8xf32>
    %183 = vector.extract_strided_slice %1 {offsets = [3, 1, 1, 0], sizes = [1, 8, 8, 4], strides = [1, 1, 1, 1]} : vector<4x9x9x4xf32> to vector<1x8x8x4xf32>
    %184 = vector.shape_cast %183 : vector<1x8x8x4xf32> to vector<8x8x4xf32>
    %cst_80 = arith.constant 0.000000e+00 : f32
    %185 = vector.broadcast %cst_80 : f32 to vector<8x8x4xf32>
    %186 = arith.cmpf oge, %184, %185 : vector<8x8x4xf32>
    %cst_81 = arith.constant 2.000000e-01 : f32
    %187 = vector.broadcast %cst_81 : f32 to vector<8x8x4xf32>
    %188 = arith.mulf %187, %184 : vector<8x8x4xf32>
    %189 = arith.select %186, %184, %188 : vector<8x8x4xi1>, vector<8x8x4xf32>
    %190 = vector.shape_cast %189 : vector<8x8x4xf32> to vector<64x4xf32>
    %c15 = arith.constant 15 : index
    %c0_82 = arith.constant 0 : index
    %c0_83 = arith.constant 0 : index
    %191 = vector.load %arg2[%c15, %c0_82, %c0_83] : memref<16x4x8xf32, #tpu.memory_space<vmem>>, vector<1x4x8xf32>
    %192 = vector.shape_cast %191 : vector<1x4x8xf32> to vector<4x8xf32>
    %cst_84 = arith.constant dense<0.000000e+00> : vector<64x8xf32>
    %193 = tpu.matmul %190, %192, %cst_84 {dimension_numbers = #tpu.dot_dimension_numbers<[1], [0], [0], [1], [0, 0, 1, 1], [], []>} : vector<64x4xf32>, vector<4x8xf32>, vector<64x8xf32> -> vector<64x8xf32>
    %194 = arith.addf %182, %193 : vector<64x8xf32>
    %c0_85 = arith.constant 0 : index
    %c0_86 = arith.constant 0 : index
    %195 = vector.load %arg3[%c0_85, %c0_86] : memref<1x8xf32, #tpu.memory_space<vmem>>, vector<1x8xf32>
    %196 = vector.broadcast %195 : vector<1x8xf32> to vector<64x8xf32>
    %197 = arith.addf %194, %196 : vector<64x8xf32>
    %cst_87 = arith.constant 0.000000e+00 : f32
    %198 = vector.broadcast %cst_87 : f32 to vector<64x8xf32>
    %199 = arith.maximumf %197, %198 : vector<64x8xf32>
    %cst_88 = arith.constant 0.000000e+00 : f32
    %200 = vector.broadcast %cst_88 : f32 to vector<10x10x8xf32>
    %c0_89 = arith.constant 0 : index
    %c0_90 = arith.constant 0 : index
    %c0_91 = arith.constant 0 : index
    %201 = vector.load %arg7[%c0_89, %c0_90, %c0_91] : memref<10x10x8xf32, #tpu.memory_space<vmem>>, vector<10x10x8xf32>
    tpu.vector_store %arg7[%c0_89, %c0_90, %c0_91], %200 {strides = array<i32>} : memref<10x10x8xf32, #tpu.memory_space<vmem>>, vector<10x10x8xf32>,
    %202 = vector.shape_cast %199 : vector<64x8xf32> to vector<8x8x8xf32>
    %c1_92 = arith.constant 1 : index
    %c1_93 = arith.constant 1 : index
    %c0_94 = arith.constant 0 : index
    %203 = vector.load %arg7[%c1_92, %c1_93, %c0_94] : memref<10x10x8xf32, #tpu.memory_space<vmem>>, vector<8x8x8xf32>
    tpu.vector_store %arg7[%c1_92, %c1_93, %c0_94], %202 {strides = array<i32>} : memref<10x10x8xf32, #tpu.memory_space<vmem>>, vector<8x8x8xf32>,
    %cst_95 = arith.constant 0.000000e+00 : f32
    %204 = vector.broadcast %cst_95 : f32 to vector<64x16xf32>
    %c0_96 = arith.constant 0 : index
    %c0_97 = arith.constant 0 : index
    %c0_98 = arith.constant 0 : index
    %205 = vector.load %arg7[%c0_96, %c0_97, %c0_98] : memref<10x10x8xf32, #tpu.memory_space<vmem>>, vector<8x8x8xf32>
    %206 = vector.shape_cast %205 : vector<8x8x8xf32> to vector<64x8xf32>
    %c0_99 = arith.constant 0 : index
    %c0_100 = arith.constant 0 : index
    %c0_101 = arith.constant 0 : index
    %207 = vector.load %arg4[%c0_99, %c0_100, %c0_101] : memref<9x8x16xf32, #tpu.memory_space<vmem>>, vector<1x8x16xf32>
    %208 = vector.shape_cast %207 : vector<1x8x16xf32> to vector<8x16xf32>
    %cst_102 = arith.constant dense<0.000000e+00> : vector<64x16xf32>
    %209 = tpu.matmul %206, %208, %cst_102 {dimension_numbers = #tpu.dot_dimension_numbers<[1], [0], [0], [1], [0, 0, 1, 1], [], []>} : vector<64x8xf32>, vector<8x16xf32>, vector<64x16xf32> -> vector<64x16xf32>
    %210 = arith.addf %204, %209 : vector<64x16xf32>
    %c0_103 = arith.constant 0 : index
    %c1_104 = arith.constant 1 : index
    %c0_105 = arith.constant 0 : index
    %211 = vector.load %arg7[%c0_103, %c1_104, %c0_105] : memref<10x10x8xf32, #tpu.memory_space<vmem>>, vector<8x8x8xf32>
    %212 = vector.shape_cast %211 : vector<8x8x8xf32> to vector<64x8xf32>
    %c1_106 = arith.constant 1 : index
    %c0_107 = arith.constant 0 : index
    %c0_108 = arith.constant 0 : index
    %213 = vector.load %arg4[%c1_106, %c0_107, %c0_108] : memref<9x8x16xf32, #tpu.memory_space<vmem>>, vector<1x8x16xf32>
    %214 = vector.shape_cast %213 : vector<1x8x16xf32> to vector<8x16xf32>
    %cst_109 = arith.constant dense<0.000000e+00> : vector<64x16xf32>
    %215 = tpu.matmul %212, %214, %cst_109 {dimension_numbers = #tpu.dot_dimension_numbers<[1], [0], [0], [1], [0, 0, 1, 1], [], []>} : vector<64x8xf32>, vector<8x16xf32>, vector<64x16xf32> -> vector<64x16xf32>
    %216 = arith.addf %210, %215 : vector<64x16xf32>
    %c0_110 = arith.constant 0 : index
    %c2_111 = arith.constant 2 : index
    %c0_112 = arith.constant 0 : index
    %217 = vector.load %arg7[%c0_110, %c2_111, %c0_112] : memref<10x10x8xf32, #tpu.memory_space<vmem>>, vector<8x8x8xf32>
    %218 = vector.shape_cast %217 : vector<8x8x8xf32> to vector<64x8xf32>
    %c2_113 = arith.constant 2 : index
    %c0_114 = arith.constant 0 : index
    %c0_115 = arith.constant 0 : index
    %219 = vector.load %arg4[%c2_113, %c0_114, %c0_115] : memref<9x8x16xf32, #tpu.memory_space<vmem>>, vector<1x8x16xf32>
    %220 = vector.shape_cast %219 : vector<1x8x16xf32> to vector<8x16xf32>
    %cst_116 = arith.constant dense<0.000000e+00> : vector<64x16xf32>
    %221 = tpu.matmul %218, %220, %cst_116 {dimension_numbers = #tpu.dot_dimension_numbers<[1], [0], [0], [1], [0, 0, 1, 1], [], []>} : vector<64x8xf32>, vector<8x16xf32>, vector<64x16xf32> -> vector<64x16xf32>
    %222 = arith.addf %216, %221 : vector<64x16xf32>
    %c1_117 = arith.constant 1 : index
    %c0_118 = arith.constant 0 : index
    %c0_119 = arith.constant 0 : index
    %223 = vector.load %arg7[%c1_117, %c0_118, %c0_119] : memref<10x10x8xf32, #tpu.memory_space<vmem>>, vector<8x8x8xf32>
    %224 = vector.shape_cast %223 : vector<8x8x8xf32> to vector<64x8xf32>
    %c3_120 = arith.constant 3 : index
    %c0_121 = arith.constant 0 : index
    %c0_122 = arith.constant 0 : index
    %225 = vector.load %arg4[%c3_120, %c0_121, %c0_122] : memref<9x8x16xf32, #tpu.memory_space<vmem>>, vector<1x8x16xf32>
    %226 = vector.shape_cast %225 : vector<1x8x16xf32> to vector<8x16xf32>
    %cst_123 = arith.constant dense<0.000000e+00> : vector<64x16xf32>
    %227 = tpu.matmul %224, %226, %cst_123 {dimension_numbers = #tpu.dot_dimension_numbers<[1], [0], [0], [1], [0, 0, 1, 1], [], []>} : vector<64x8xf32>, vector<8x16xf32>, vector<64x16xf32> -> vector<64x16xf32>
    %228 = arith.addf %222, %227 : vector<64x16xf32>
    %c1_124 = arith.constant 1 : index
    %c1_125 = arith.constant 1 : index
    %c0_126 = arith.constant 0 : index
    %229 = vector.load %arg7[%c1_124, %c1_125, %c0_126] : memref<10x10x8xf32, #tpu.memory_space<vmem>>, vector<8x8x8xf32>
    %230 = vector.shape_cast %229 : vector<8x8x8xf32> to vector<64x8xf32>
    %c4_127 = arith.constant 4 : index
    %c0_128 = arith.constant 0 : index
    %c0_129 = arith.constant 0 : index
    %231 = vector.load %arg4[%c4_127, %c0_128, %c0_129] : memref<9x8x16xf32, #tpu.memory_space<vmem>>, vector<1x8x16xf32>
    %232 = vector.shape_cast %231 : vector<1x8x16xf32> to vector<8x16xf32>
    %cst_130 = arith.constant dense<0.000000e+00> : vector<64x16xf32>
    %233 = tpu.matmul %230, %232, %cst_130 {dimension_numbers = #tpu.dot_dimension_numbers<[1], [0], [0], [1], [0, 0, 1, 1], [], []>} : vector<64x8xf32>, vector<8x16xf32>, vector<64x16xf32> -> vector<64x16xf32>
    %234 = arith.addf %228, %233 : vector<64x16xf32>
    %c1_131 = arith.constant 1 : index
    %c2_132 = arith.constant 2 : index
    %c0_133 = arith.constant 0 : index
    %235 = vector.load %arg7[%c1_131, %c2_132, %c0_133] : memref<10x10x8xf32, #tpu.memory_space<vmem>>, vector<8x8x8xf32>
    %236 = vector.shape_cast %235 : vector<8x8x8xf32> to vector<64x8xf32>
    %c5_134 = arith.constant 5 : index
    %c0_135 = arith.constant 0 : index
    %c0_136 = arith.constant 0 : index
    %237 = vector.load %arg4[%c5_134, %c0_135, %c0_136] : memref<9x8x16xf32, #tpu.memory_space<vmem>>, vector<1x8x16xf32>
    %238 = vector.shape_cast %237 : vector<1x8x16xf32> to vector<8x16xf32>
    %cst_137 = arith.constant dense<0.000000e+00> : vector<64x16xf32>
    %239 = tpu.matmul %236, %238, %cst_137 {dimension_numbers = #tpu.dot_dimension_numbers<[1], [0], [0], [1], [0, 0, 1, 1], [], []>} : vector<64x8xf32>, vector<8x16xf32>, vector<64x16xf32> -> vector<64x16xf32>
    %240 = arith.addf %234, %239 : vector<64x16xf32>
    %c2_138 = arith.constant 2 : index
    %c0_139 = arith.constant 0 : index
    %c0_140 = arith.constant 0 : index
    %241 = vector.load %arg7[%c2_138, %c0_139, %c0_140] : memref<10x10x8xf32, #tpu.memory_space<vmem>>, vector<8x8x8xf32>
    %242 = vector.shape_cast %241 : vector<8x8x8xf32> to vector<64x8xf32>
    %c6_141 = arith.constant 6 : index
    %c0_142 = arith.constant 0 : index
    %c0_143 = arith.constant 0 : index
    %243 = vector.load %arg4[%c6_141, %c0_142, %c0_143] : memref<9x8x16xf32, #tpu.memory_space<vmem>>, vector<1x8x16xf32>
    %244 = vector.shape_cast %243 : vector<1x8x16xf32> to vector<8x16xf32>
    %cst_144 = arith.constant dense<0.000000e+00> : vector<64x16xf32>
    %245 = tpu.matmul %242, %244, %cst_144 {dimension_numbers = #tpu.dot_dimension_numbers<[1], [0], [0], [1], [0, 0, 1, 1], [], []>} : vector<64x8xf32>, vector<8x16xf32>, vector<64x16xf32> -> vector<64x16xf32>
    %246 = arith.addf %240, %245 : vector<64x16xf32>
    %c2_145 = arith.constant 2 : index
    %c1_146 = arith.constant 1 : index
    %c0_147 = arith.constant 0 : index
    %247 = vector.load %arg7[%c2_145, %c1_146, %c0_147] : memref<10x10x8xf32, #tpu.memory_space<vmem>>, vector<8x8x8xf32>
    %248 = vector.shape_cast %247 : vector<8x8x8xf32> to vector<64x8xf32>
    %c7_148 = arith.constant 7 : index
    %c0_149 = arith.constant 0 : index
    %c0_150 = arith.constant 0 : index
    %249 = vector.load %arg4[%c7_148, %c0_149, %c0_150] : memref<9x8x16xf32, #tpu.memory_space<vmem>>, vector<1x8x16xf32>
    %250 = vector.shape_cast %249 : vector<1x8x16xf32> to vector<8x16xf32>
    %cst_151 = arith.constant dense<0.000000e+00> : vector<64x16xf32>
    %251 = tpu.matmul %248, %250, %cst_151 {dimension_numbers = #tpu.dot_dimension_numbers<[1], [0], [0], [1], [0, 0, 1, 1], [], []>} : vector<64x8xf32>, vector<8x16xf32>, vector<64x16xf32> -> vector<64x16xf32>
    %252 = arith.addf %246, %251 : vector<64x16xf32>
    %c2_152 = arith.constant 2 : index
    %c2_153 = arith.constant 2 : index
    %c0_154 = arith.constant 0 : index
    %253 = vector.load %arg7[%c2_152, %c2_153, %c0_154] : memref<10x10x8xf32, #tpu.memory_space<vmem>>, vector<8x8x8xf32>
    %254 = vector.shape_cast %253 : vector<8x8x8xf32> to vector<64x8xf32>
    %c8_155 = arith.constant 8 : index
    %c0_156 = arith.constant 0 : index
    %c0_157 = arith.constant 0 : index
    %255 = vector.load %arg4[%c8_155, %c0_156, %c0_157] : memref<9x8x16xf32, #tpu.memory_space<vmem>>, vector<1x8x16xf32>
    %256 = vector.shape_cast %255 : vector<1x8x16xf32> to vector<8x16xf32>
    %cst_158 = arith.constant dense<0.000000e+00> : vector<64x16xf32>
    %257 = tpu.matmul %254, %256, %cst_158 {dimension_numbers = #tpu.dot_dimension_numbers<[1], [0], [0], [1], [0, 0, 1, 1], [], []>} : vector<64x8xf32>, vector<8x16xf32>, vector<64x16xf32> -> vector<64x16xf32>
    %258 = arith.addf %252, %257 : vector<64x16xf32>
    %c0_159 = arith.constant 0 : index
    %c0_160 = arith.constant 0 : index
    %259 = vector.load %arg5[%c0_159, %c0_160] : memref<1x16xf32, #tpu.memory_space<vmem>>, vector<1x16xf32>
    %260 = vector.broadcast %259 : vector<1x16xf32> to vector<64x16xf32>
    %261 = arith.addf %258, %260 : vector<64x16xf32>
    %c0_161 = arith.constant 0 : index
    %c0_162 = arith.constant 0 : index
    %c0_163 = arith.constant 0 : index
    %262 = vector.load %arg6[%c0_161, %c0_162, %c0_163] : memref<1x64x16xf32, #tpu.memory_space<vmem>>, vector<1x64x16xf32>
    %263 = vector.shape_cast %262 : vector<1x64x16xf32> to vector<64x16xf32>
    %264 = vector.shape_cast %261 : vector<64x16xf32> to vector<1x64x16xf32>
    tpu.vector_store %arg6[%c0_161, %c0_162, %c0_163], %264 {strides = array<i32>} : memref<1x64x16xf32, #tpu.memory_space<vmem>>, vector<1x64x16xf32>,
    return
  }
  func.func @transform_0(%arg0: i32) -> (i32, i32, i32, i32, i32) {
    %c0_i32 = arith.constant 0 : i32
    %c0_i32_0 = arith.constant 0 : i32
    %c0_i32_1 = arith.constant 0 : i32
    %c0_i32_2 = arith.constant 0 : i32
    %c0_i32_3 = arith.constant 0 : i32
    return %arg0, %c0_i32, %c0_i32_0, %c0_i32_1, %c0_i32_2 : i32, i32, i32, i32, i32
  }
  func.func @transform_1(%arg0: i32) -> (i32, i32, i32) {
    %c0_i32 = arith.constant 0 : i32
    %c0_i32_0 = arith.constant 0 : i32
    %c0_i32_1 = arith.constant 0 : i32
    %c0_i32_2 = arith.constant 0 : i32
    return %c0_i32, %c0_i32_0, %c0_i32_1 : i32, i32, i32
  }
  func.func @transform_2(%arg0: i32) -> (i32, i32) {
    %c0_i32 = arith.constant 0 : i32
    %c0_i32_0 = arith.constant 0 : i32
    %c0_i32_1 = arith.constant 0 : i32
    return %c0_i32, %c0_i32_0 : i32, i32
  }
  func.func @transform_3(%arg0: i32) -> (i32, i32, i32) {
    %c0_i32 = arith.constant 0 : i32
    %c0_i32_0 = arith.constant 0 : i32
    %c0_i32_1 = arith.constant 0 : i32
    %c0_i32_2 = arith.constant 0 : i32
    return %c0_i32, %c0_i32_0, %c0_i32_1 : i32, i32, i32
  }
  func.func @transform_4(%arg0: i32) -> (i32, i32) {
    %c0_i32 = arith.constant 0 : i32
    %c0_i32_0 = arith.constant 0 : i32
    %c0_i32_1 = arith.constant 0 : i32
    return %c0_i32, %c0_i32_0 : i32, i32
  }
  func.func @transform_5(%arg0: i32) -> (i32, i32, i32) {
    %c0_i32 = arith.constant 0 : i32
    %c0_i32_0 = arith.constant 0 : i32
    %c0_i32_1 = arith.constant 0 : i32
    return %arg0, %c0_i32, %c0_i32_0 : i32, i32, i32
  }
}

</mosaic_0001>

<bundles_post_ra>
// kernel: unet_block_forward.1
= control target key start
LH: loop header
LB: loop body
LE: loop exit
PB: predicated region body
PF: predicated region fallthrough
CT: control target
= control target key end

     0   :  { %s5213_s18 = smov 0   ;;  %s6070_s0 = inlined_call_operand.vmem [shape: f32[2,4,9,9,4], index: 0, kind: input, shape index: {}]   ;;  %s6071_s1 = inlined_call_operand.vmem [shape: f32[16,4,8], index: 1, kind: input, shape index: {}]   ;;  %s6072_s2 = inlined_call_operand.vmem [shape: f32[1,8], index: 2, kind: input, shape index: {}]   ;;  %s6073_s3 = inlined_call_operand.vmem [shape: f32[9,8,16], index: 3, kind: input, shape index: {}]   ;;  %s6074_s4 = inlined_call_operand.vmem [shape: f32[1,16], index: 4, kind: input, shape index: {}]   ;;  %s6075_s5 = inlined_call_operand.vmem [shape: f32[2,64,16], index: 5, kind: output, shape index: {}]  }
   0x1 LB: > { %s4151_s19 = sadd.s32 4294967295, %s5180_s18   ;;  %p4155_p0 = scmp.ge.s32.totalorder %s5180_s18, 1  ;;  %s5180_s18 = sphi %s5213_s18, %s15_s18  }
   0x2   : > { %p187_p1 = scmp.lt.s32.totalorder %s5180_s18, 3 }
   0x4   : > { %p188_p2 = pnand %p4155_p0, %p187_p1 }
   0x6   : > { %191 = sbr.rel (%p188_p2) target bundleno = 795 (0x31b), region = 40 }
   0xd   : > { %vm373_vm0 = vcmask 1043456   ;;  %v5224_v0 = vld [vmem:[%s6071_s1 + $0xc] sm:$0xf]  ;;  %p215_p3 = scmp.lt.s32.totalorder %s4151_s19, 1  ;;  %v5231_v1 = vld [vmem:[%s6071_s1 + $0x10] sm:$0xf] }
   0xe   : > { %4670 = vmatprep.subr.msk.mxu0 %vm373_vm0, %v5224_v0  ;;  %v4159_v2 = vld [vmem:[%s6071_s1 + $0x4] sm:$0xf]  ;;  %v321_v3 = vld [vmem:[%s6071_s1] sm:$0xf]  ;;  %vm348_vm1 = vcmask 31744   ;;  %vm646_vm2 = vcmask 1046528  }
   0xf   : > { %4671 = vmatpush3.msk.msra.mxu0 %vm373_vm0, %v5224_v0  ;;  %s6089_s19 = smov (!%p215_p3, %s4151_s19), 1  ;;  %4628 = vmatprep.subr.msk.mxu1 %vm373_vm0, %v4159_v2  ;;  %v4208_v35 = vld [vmem:[%s6071_s1 + $0x14] sm:$0xf]  ;;  %v4218_v56 = vld [vmem:[%s6071_s1 + $0x18] sm:$0xf] }
  0x10   : > { %4684 = vmatprep.subr.msk.mxu0 %vm373_vm0, %v5231_v1  ;;  %s5164_s26 = smul.u32 576, %s6089_s19  ;;  %4629 = vmatpush3.msk.msra.mxu1 %vm373_vm0, %v4159_v2  ;;  %s4402_s30 = sshll.u32 %s6089_s19, 6 }
  0x11   : > { %4642 = vmatprep.subr.msk.mxu1 %vm373_vm0, %v321_v3  ;;  %s224_s10 = scalar_lea.vmem %s6075_s5, %s4402_s30 }
  0x12   : > { %s5251_s6 = scalar_lea.vmem %s6070_s0, %s5164_s26 }
  0x13   : > { %v243_v4 = vld [vmem:[%s5251_s6 + $0x90] sm:$0xff]  ;;  %v244_v5 = vld [vmem:[%s5251_s6 + $0x98] sm:$0x1]  ;;  %v245_v6 = vld [vmem:[%s5251_s6 + $0xa0] sm:$0xff] }
  0x14   : > { %vm322_vm3 = vcmp.ge.f32.partialorder %v243_v4, 0.0  ;;  %v330_v7 = vmul.f32 0.2, %v243_v4  ;;  %vm805_vm4 = vcmp.ge.f32.partialorder %v244_v5, 0.0  ;;  %v813_v8 = vmul.f32 0.2, %v244_v5 }
  0x15   : > { %v246_v9 = vld [vmem:[%s5251_s6 + $0xa8] sm:$0x1]  ;;  %vm323_vm5 = vcmp.ge.f32.partialorder %v245_v6, 0.0  ;;  %v331_v10 = vmul.f32 0.2, %v245_v6  ;;  %v247_v11 = vld [vmem:[%s5251_s6 + $0xb0] sm:$0xff] }
  0x16   : > { %v338_v12 = vsel %vm322_vm3, %v243_v4, %v330_v7  ;;  %v821_v13 = vsel %vm805_vm4, %v244_v5, %v813_v8  ;;  %vm806_vm6 = vcmp.ge.f32.partialorder %v246_v9, 0.0  ;;  %v814_v14 = vmul.f32 0.2, %v246_v9  ;;  %v248_v15 = vld [vmem:[%s5251_s6 + $0xb8] sm:$0x1]  ;;  %v249_v16 = vld [vmem:[%s5251_s6 + $0xc0] sm:$0xff] }
  0x17   : > { %v837_v17 = vrot.slane %v338_v12, 1  ;;  %v838_v18 = vrot.slane %v821_v13, 1  ;;  %v5261_v19 = vsel %vm323_vm5, %v245_v6, %v331_v10  ;;  %vm324_vm7 = vcmp.ge.f32.partialorder %v247_v11, 0.0  ;;  %v250_v20 = vld [vmem:[%s5251_s6 + $0xc8] sm:$0x1]  ;;  %4630 = vmatprep.mubr.msk.f32.mxu1 %vm348_vm1, %v338_v12  ;;  %v261_v24 = vld [vmem:[%s5251_s6 + $0x120] sm:$0xff] }
  0x18   : > { %v822_v21 = vsel %vm806_vm6, %v246_v9, %v814_v14  ;;  %v840_v22 = vrot.slane %v5261_v19, 1  ;;  %v332_v23 = vmul.f32 0.2, %v247_v11  ;;  %vm807_vm8 = vcmp.ge.f32.partialorder %v248_v15, 0.0  ;;  %4631 = vmatmul.mubr.msk.f32.vlgmr.msra.gmra.mrb[0].mxu1 %vm348_vm1, %v5261_v19  ;;  %v263_v31 = vld [vmem:[%s5251_s6 + $0x130] sm:$0xff]  ;;  %v265_v36 = vld [vmem:[%s5251_s6 + $0x140] sm:$0xff] }
  0x19   : > { %v839_v25 = vsel %vm646_vm2, %v837_v17, %v838_v18  ;;  %v841_v26 = vrot.slane %v822_v21, 1  ;;  %v815_v27 = vmul.f32 0.2, %v248_v15  ;;  %vm325_vm9 = vcmp.ge.f32.partialorder %v249_v16, 0.0  ;;  %4643 = vmatpush3.msk.msra.mxu1 %vm373_vm0, %v321_v3  ;;  %v267_v47 = vld [vmem:[%s5251_s6 + $0x150] sm:$0xff]  ;;  %v269_v49 = vld [vmem:[%s5251_s6 + $0x160] sm:$0xff] }
  0x1a   : > { %4672 = vmatprep.mubr.msk.f32.mxu0 %vm348_vm1, %v839_v25  ;;  %v5272_v28 = vsel %vm324_vm7, %v247_v11, %v332_v23  ;;  %v333_v29 = vmul.f32 0.2, %v249_v16  ;;  %vm808_vm10 = vcmp.ge.f32.partialorder %v250_v20, 0.0  ;;  %v816_v30 = vmul.f32 0.2, %v250_v20  ;;  %v271_v54 = vld [vmem:[%s5251_s6 + $0x170] sm:$0xff] }
  0x1b   : > { %v5276_v32 = vsel %vm646_vm2, %v840_v22, %v841_v26  ;;  %v823_v33 = vsel %vm807_vm8, %v248_v15, %v815_v27  ;;  %v843_v34 = vrot.slane %v5272_v28, 1  ;;  %vm995_vm11 = vcmp.ge.f32.partialorder %v261_v24, 0.0  ;;  %4633 = vmatprep.mubr.msk.f32.mxu1 %vm348_vm1, %v5272_v28  ;;  %v273_v55 = vld [vmem:[%s5251_s6 + $0x180] sm:$0xff]  ;;  %v275_v61 = vld [vmem:[%s5251_s6 + $0x190] sm:$0xff]  ;;  %v262_v12 = vld [vmem:[%s5251_s6 + $0x128] sm:$0x1] }
  0x1c   : > { %4673 = vmatmul.mubr.msk.f32.vlgmr.msra.gmra.mrb[0].mxu0 %vm348_vm1, %v5276_v32  ;;  %v844_v37 = vrot.slane %v823_v33, 1  ;;  %v5288_v38 = vsel %vm325_vm9, %v249_v16, %v333_v29  ;;  %v824_v39 = vsel %vm808_vm10, %v250_v20, %v816_v30  ;;  %v1003_v40 = vmul.f32 0.2, %v261_v24  ;;  %v279_v62 = vld [vmem:[%s5251_s6 + $0x1b0] sm:$0xff]  ;;  %v281_v4 = vld [vmem:[%s5251_s6 + $0x1c0] sm:$0xff] }
  0x1d   : > { %4685 = vmatpush3.msk.msra.mxu0 %vm373_vm0, %v5231_v1  ;;  %v846_v41 = vrot.slane %v5288_v38, 1  ;;  %v847_v42 = vrot.slane %v824_v39, 1  ;;  %v1004_v43 = vmul.f32 0.2, %v263_v31  ;;  %4634 = vmatmul.mubr.msk.f32.gmra.mrb[2].mxu1 %vm348_vm1, %v5288_v38  ;;  %vm996_vm12 = vcmp.ge.f32.partialorder %v263_v31, 0.0  ;;  %v283_v5 = vld [vmem:[%s5251_s6 + $0x1d0] sm:$0xff] }
  0x1e   : > { %v5296_v44 = vsel %vm646_vm2, %v843_v34, %v844_v37  ;;  %v5298_v45 = vsel %vm995_vm11, %v261_v24, %v1003_v40  ;;  %4698 = vmatprep.subr.msk.mxu0 %vm373_vm0, %v4208_v35  ;;  %v1005_v46 = vmul.f32 0.2, %v265_v36  ;;  %vm997_vm13 = vcmp.ge.f32.partialorder %v265_v36, 0.0  ;;  %v285_v10 = vld [vmem:[%s5251_s6 + $0x1e0] sm:$0xff]  ;;  %v287_v11 = vld [vmem:[%s5251_s6 + $0x1f0] sm:$0xff] }
  0x1f   : > { %4675 = vmatprep.mubr.msk.f32.mxu0 %vm348_vm1, %v5296_v44  ;;  %v5305_v48 = vsel %vm646_vm2, %v846_v41, %v847_v42  ;;  %v5312_v50 = vsel %vm996_vm12, %v263_v31, %v1004_v43  ;;  %v1006_v51 = vmul.f32 0.2, %v267_v47  ;;  %vm998_vm14 = vcmp.ge.f32.partialorder %v267_v47, 0.0  ;;  %v264_v15 = vld [vmem:[%s5251_s6 + $0x138] sm:$0x1]  ;;  %v289_v18 = vld [vmem:[%s5251_s6 + $0x200] sm:$0xff] }
  0x20   : > { %4676 = vmatmul.mubr.msk.f32.gmra.mrb[2].mxu0 %vm348_vm1, %v5305_v48  ;;  %v5314_v52 = vsel %vm997_vm13, %v265_v36, %v1005_v46  ;;  %v1007_v53 = vmul.f32 0.2, %v269_v49  ;;  %vm999_vm15 = vcmp.ge.f32.partialorder %v269_v49, 0.0  ;;  %v1008_v58 = vmul.f32 0.2, %v271_v54  ;;  %v291_v21 = vld [vmem:[%s5251_s6 + $0x210] sm:$0xff] }
  0x21   : > { %4686 = vmatprep.mubr.msk.f32.mxu0 %vm348_vm1, %v5298_v45  ;;  %v5326_v57 = vsel %vm998_vm14, %v267_v47, %v1006_v51  ;;  %vm1000_vm3 = vcmp.ge.f32.partialorder %v271_v54, 0.0  ;;  %v1009_v60 = vmul.f32 0.2, %v273_v55  ;;  %vm1001_vm4 = vcmp.ge.f32.partialorder %v273_v55, 0.0  ;;  %v5368_v22 = vld [vmem:[%s6071_s1 + $0x1c] sm:$0xf] }
  0x22   : > { %v5328_v59 = vsel %vm999_vm15, %v269_v49, %v1007_v53  ;;  %v5337_v63 = vsel %vm1000_vm3, %v271_v54, %v1008_v58  ;;  %v1010_v1 = vmul.f32 0.2, %v275_v61  ;;  %vm1002_vm5 = vcmp.ge.f32.partialorder %v275_v61, 0.0  ;;  %v266_v23 = vld [vmem:[%s5251_s6 + $0x148] sm:$0x1]  ;;  %v293_v30 = vld [vmem:[%s5251_s6 + $0x220] sm:$0xff] }
  0x23   : > { %v5339_v2 = vsel %vm1001_vm4, %v273_v55, %v1009_v60  ;;  %v1169_v3 = vmul.f32 0.2, %v279_v62  ;;  %vm1161_vm6 = vcmp.ge.f32.partialorder %v279_v62, 0.0  ;;  %v1170_v7 = vmul.f32 0.2, %v281_v4 }
  0x24   : > { %4687 = vmatmul.mubr.msk.f32.vlgmr.msra.gmra.mrb[0].mxu0 %vm348_vm1, %v5312_v50  ;;  %v5347_v6 = vsel %vm1002_vm5, %v275_v61, %v1010_v1  ;;  %vm1162_vm7 = vcmp.ge.f32.partialorder %v281_v4, 0.0  ;;  %v1171_v9 = vmul.f32 0.2, %v283_v5  ;;  %vm1163_vm8 = vcmp.ge.f32.partialorder %v283_v5, 0.0  ;;  %v268_v33 = vld [vmem:[%s5251_s6 + $0x158] sm:$0x1] }
  0x25   : > { %4699 = vmatpush3.msk.msra.mxu0 %vm373_vm0, %v4208_v35  ;;  %4689 = vmatprep.mubr.msk.f32.mxu0 %vm348_vm1, %v5314_v52  ;;  %v5349_v8 = vsel %vm1161_vm6, %v279_v62, %v1169_v3  ;;  %v5358_v13 = vsel %vm1162_vm7, %v281_v4, %v1170_v7  ;;  %v1172_v14 = vmul.f32 0.2, %v285_v10  ;;  %vm1164_vm9 = vcmp.ge.f32.partialorder %v285_v10, 0.0  ;;  %v270_v35 = vld [vmem:[%s5251_s6 + $0x168] sm:$0x1] }
  0x26   : > { %4712 = vmatprep.subr.msk.mxu0 %vm373_vm0, %v4218_v56  ;;  %v5361_v16 = vsel %vm1163_vm8, %v283_v5, %v1171_v9  ;;  %v1173_v17 = vmul.f32 0.2, %v287_v11  ;;  %v1335_v20 = vmul.f32 0.2, %v262_v12  ;;  %vm1165_vm10 = vcmp.ge.f32.partialorder %v287_v11, 0.0 }
  0x27   : > { %vm1327_vm11 = vcmp.ge.f32.partialorder %v262_v12, 0.0  ;;  %v5376_v24 = vsel %vm1164_vm9, %v285_v10, %v1172_v14  ;;  %vm1166_vm12 = vcmp.ge.f32.partialorder %v289_v18, 0.0  ;;  %v1174_v25 = vmul.f32 0.2, %v289_v18  ;;  %v272_v42 = vld [vmem:[%s5251_s6 + $0x178] sm:$0x1] }
  0x28   : > { %4690 = vmatmul.mubr.msk.f32.gmra.mrb[2].mxu0 %vm348_vm1, %v5326_v57  ;;  %v1336_v26 = vmul.f32 0.2, %v264_v15  ;;  %v5378_v27 = vsel %vm1165_vm10, %v287_v11, %v1173_v17  ;;  %v1175_v29 = vmul.f32 0.2, %v291_v21  ;;  %v1343_v31 = vsel %vm1327_vm11, %v262_v12, %v1335_v20  ;;  %v274_v49 = vld [vmem:[%s5251_s6 + $0x188] sm:$0x1] }
  0x29   : > { %4692 = vmatprep.mubr.msk.f32.mxu0 %vm348_vm1, %v5328_v59  ;;  %vm1328_vm13 = vcmp.ge.f32.partialorder %v264_v15, 0.0  ;;  %vm1167_vm14 = vcmp.ge.f32.partialorder %v291_v21, 0.0  ;;  %v1337_v34 = vmul.f32 0.2, %v266_v23  ;;  %v1359_v36 = vrot.slane %v5298_v45, 1 }
  0x2a   : > { %vm1329_vm15 = vcmp.ge.f32.partialorder %v266_v23, 0.0  ;;  %v5391_v37 = vsel %vm1166_vm12, %v289_v18, %v1174_v25  ;;  %v1176_v39 = vmul.f32 0.2, %v293_v30  ;;  %v1360_v40 = vrot.slane %v1343_v31, 1  ;;  %v276_v3 = vld [vmem:[%s5251_s6 + $0x198] sm:$0x1] }
  0x2b   : > { %v1344_v41 = vsel %vm1328_vm13, %v264_v15, %v1336_v26  ;;  %v5394_v43 = vsel %vm1167_vm14, %v291_v21, %v1175_v29  ;;  %vm1168_vm3 = vcmp.ge.f32.partialorder %v293_v30, 0.0  ;;  %v1338_v46 = vmul.f32 0.2, %v268_v33  ;;  %v280_v4 = vld [vmem:[%s5251_s6 + $0x1b8] sm:$0x1] }
  0x2c   : > { %4693 = vmatmul.mubr.msk.f32.gmra.mrb[4].mxu0 %vm348_vm1, %v5337_v63  ;;  %v1339_v45 = vmul.f32 0.2, %v270_v35  ;;  %v1345_v47 = vsel %vm1329_vm15, %v266_v23, %v1337_v34  ;;  %vm1330_vm4 = vcmp.ge.f32.partialorder %v268_v33, 0.0  ;;  %vm1331_vm5 = vcmp.ge.f32.partialorder %v270_v35, 0.0  ;;  %v5411_v5 = vld [vmem:[%s6071_s1 + $0x8] sm:$0xf] }
  0x2d   : > { %4695 = vmatprep.mubr.msk.f32.mxu0 %vm348_vm1, %v5339_v2  ;;  %v1362_v51 = vrot.slane %v5312_v50, 1  ;;  %v1365_v53 = vrot.slane %v5314_v52, 1  ;;  %v1363_v54 = vrot.slane %v1344_v41, 1  ;;  %v5403_v55 = vsel %vm1168_vm3, %v293_v30, %v1176_v39  ;;  %4656 = vmatprep.subr.msk.mxu1 %vm373_vm0, %v5411_v5  ;;  %v282_v21 = vld [vmem:[%s5251_s6 + $0x1c8] sm:$0x1]  ;;  %v251_v34 = vld [vmem:[%s5251_s6 + $0xd0] sm:$0xff] }
  0x2e   : > { %vm1332_vm6 = vcmp.ge.f32.partialorder %v272_v42, 0.0  ;;  %v1340_v58 = vmul.f32 0.2, %v272_v42  ;;  %v1366_v60 = vrot.slane %v1345_v47, 1  ;;  %v1346_v61 = vsel %vm1330_vm4, %v268_v33, %v1338_v46  ;;  %v5433_v26 = vld [vmem:[%s6071_s1 + $0x20] sm:$0xf] }
  0x2f   : > { %v1347_v62 = vsel %vm1331_vm5, %v270_v35, %v1339_v45  ;;  %v1341_v1 = vmul.f32 0.2, %v274_v49  ;;  %vm1333_vm7 = vcmp.ge.f32.partialorder %v274_v49, 0.0  ;;  %v1368_v7 = vrot.slane %v5326_v57, 1  ;;  %v284_v33 = vld [vmem:[%s5251_s6 + $0x1d8] sm:$0x1] }
  0x30   : > { %4696 = vmatmul.mubr.msk.f32.gmra.mrb[6].mxu0 %vm348_vm1, %v5347_v6  ;;  %v1371_v9 = vrot.slane %v5328_v59, 1  ;;  %v5418_v10 = vsel %vm646_vm2, %v1362_v51, %v1363_v54  ;;  %v1369_v11 = vrot.slane %v1346_v61, 1  ;;  %v1372_v12 = vrot.slane %v1347_v62, 1  ;;  %v286_v45 = vld [vmem:[%s5251_s6 + $0x1e8] sm:$0x1]  ;;  %v255_v47 = vld [vmem:[%s5251_s6 + $0xf0] sm:$0xff] }
  0x31   : > { %4700 = vmatprep.mubr.msk.f32.mxu0 %vm348_vm1, %v5349_v8  ;;  %v1348_v14 = vsel %vm1332_vm6, %v272_v42, %v1340_v58  ;;  %v1342_v15 = vmul.f32 0.2, %v276_v3  ;;  %v5425_v17 = vsel %vm646_vm2, %v1365_v53, %v1366_v60  ;;  %v1349_v18 = vsel %vm1333_vm7, %v274_v49, %v1341_v1  ;;  %v288_v53 = vld [vmem:[%s5251_s6 + $0x1f8] sm:$0x1]  ;;  %v290_v61 = vld [vmem:[%s5251_s6 + $0x208] sm:$0x1] }
  0x32   : > { %vm1334_vm8 = vcmp.ge.f32.partialorder %v276_v3, 0.0  ;;  %v1525_v20 = vmul.f32 0.2, %v280_v4  ;;  %v1374_v23 = vrot.slane %v5337_v63, 1  ;;  %v1377_v25 = vrot.slane %v5339_v2, 1  ;;  %v257_v62 = vld [vmem:[%s5251_s6 + $0x100] sm:$0xff] }
  0x33   : > { %vm1517_vm9 = vcmp.ge.f32.partialorder %v280_v4, 0.0  ;;  %v1380_v29 = vrot.slane %v5347_v6, 1  ;;  %v1549_v30 = vrot.slane %v5349_v8, 1  ;;  %v1375_v31 = vrot.slane %v1348_v14, 1  ;;  %v292_v14 = vld [vmem:[%s5251_s6 + $0x218] sm:$0x1] }
  0x34   : > { %4701 = vmatmul.mubr.msk.f32.vlgmr.msra.gmra.mrb[0].mxu0 %vm348_vm1, %v5358_v13  ;;  %v5446_v35 = vsel %vm646_vm2, %v1368_v7, %v1369_v11  ;;  %v1350_v8 = vsel %vm1334_vm8, %v276_v3, %v1342_v15  ;;  %v1526_v39 = vmul.f32 0.2, %v282_v21  ;;  %v5451_v41 = vsel %vm646_vm2, %v1371_v9, %v1372_v12 }
  0x35   : > { %4713 = vmatpush3.msk.msra.mxu0 %vm373_vm0, %v4218_v56  ;;  %4703 = vmatprep.mubr.msk.f32.mxu0 %vm348_vm1, %v5361_v16  ;;  %v1361_v56 = vsel %vm646_vm2, %v1359_v36, %v1360_v40  ;;  %v1378_v36 = vrot.slane %v1349_v18, 1  ;;  %v1552_v40 = vrot.slane %v5358_v13, 1  ;;  %v1533_v42 = vsel %vm1517_vm9, %v280_v4, %v1525_v20 }
  0x36   : > { %4726 = vmatprep.subr.msk.mxu0 %vm373_vm0, %v5368_v22  ;;  %vm1518_vm10 = vcmp.ge.f32.partialorder %v282_v21, 0.0  ;;  %v1527_v46 = vmul.f32 0.2, %v284_v33  ;;  %vm326_vm11 = vcmp.ge.f32.partialorder %v251_v34, 0.0  ;;  %v5462_v49 = vsel %vm646_vm2, %v1374_v23, %v1375_v31 }
  0x37   : > { %v1381_v51 = vrot.slane %v1350_v8, 1  ;;  %vm1519_vm12 = vcmp.ge.f32.partialorder %v284_v33, 0.0  ;;  %v334_v54 = vmul.f32 0.2, %v251_v34  ;;  %v1550_v58 = vrot.slane %v1533_v42, 1 }
  0x38   : > { %4704 = vmatmul.mubr.msk.f32.gmra.mrb[2].mxu0 %vm348_vm1, %v5376_v24  ;;  %v1534_v60 = vsel %vm1518_vm10, %v282_v21, %v1526_v39  ;;  %v1528_v1 = vmul.f32 0.2, %v286_v45  ;;  %vm328_vm14 = vcmp.ge.f32.partialorder %v255_v47, 0.0  ;;  %v1535_v7 = vsel %vm1519_vm12, %v284_v33, %v1527_v46  ;;  %v294_v8 = vld [vmem:[%s5251_s6 + $0x228] sm:$0x1] }
  0x39   : > { %4706 = vmatprep.mubr.msk.f32.mxu0 %vm348_vm1, %v5378_v27  ;;  %v5473_v3 = vsel %vm326_vm11, %v251_v34, %v334_v54  ;;  %vm1520_vm15 = vcmp.ge.f32.partialorder %v286_v45, 0.0  ;;  %v1529_v9 = vmul.f32 0.2, %v288_v53  ;;  %v336_v11 = vmul.f32 0.2, %v255_v47 }
  0x3a   : > { %4636 = vmatprep.mubr.msk.f32.mxu1 %vm348_vm1, %v5473_v3  ;;  %v1555_v12 = vrot.slane %v5361_v16, 1  ;;  %vm1521_vm3 = vcmp.ge.f32.partialorder %v288_v53, 0.0  ;;  %v337_v18 = vmul.f32 0.2, %v257_v62  ;;  %v5486_v20 = vsel %vm646_vm2, %v1380_v29, %v1381_v51 }
  0x3b   : > { %v1553_v21 = vrot.slane %v1534_v60, 1  ;;  %v5488_v23 = vsel %vm328_vm14, %v255_v47, %v336_v11  ;;  %vm329_vm4 = vcmp.ge.f32.partialorder %v257_v62, 0.0  ;;  %v1556_v31 = vrot.slane %v1535_v7, 1  ;;  %v5516_v60 = vld [vmem:[%s6071_s1 + $0x24] sm:$0xf] }
  0x3c   : > { %4707 = vmatmul.mubr.msk.f32.gmra.mrb[4].mxu0 %vm348_vm1, %v5391_v37  ;;  %v1536_v33 = vsel %vm1520_vm15, %v286_v45, %v1528_v1  ;;  %v1530_v34 = vmul.f32 0.2, %v290_v61  ;;  %vm1522_vm5 = vcmp.ge.f32.partialorder %v290_v61, 0.0  ;;  %v1531_v29 = vmul.f32 0.2, %v292_v14 }
  0x3d   : > { %4709 = vmatprep.mubr.msk.f32.mxu0 %vm348_vm1, %v5394_v43  ;;  %vm1523_vm6 = vcmp.ge.f32.partialorder %v292_v14, 0.0  ;;  %v5499_v39 = vsel %vm329_vm4, %v257_v62, %v337_v18  ;;  %v1561_v42 = vrot.slane %v5378_v27, 1  ;;  %v1559_v46 = vrot.slane %v1536_v33, 1  ;;  %v225_v62 = vld [vmem:[%s5251_s6] sm:$0xff]  ;;  %v231_v18 = vld [vmem:[%s5251_s6 + $0x30] sm:$0xff] }
  0x3e   : > { %v5510_v45 = vsel %vm646_vm2, %v1555_v12, %v1556_v31  ;;  %v1538_v51 = vsel %vm1522_vm5, %v290_v61, %v1530_v34  ;;  %v1539_v54 = vsel %vm1523_vm6, %v292_v14, %v1531_v29  ;;  %vm1524_vm7 = vcmp.ge.f32.partialorder %v294_v8, 0.0 }
  0x3f   : > { %v1564_v1 = vrot.slane %v5391_v37, 1  ;;  %v1565_v7 = vrot.slane %v1538_v51, 1  ;;  %v1568_v11 = vrot.slane %v1539_v54, 1  ;;  %vm297_vm9 = vcmp.ge.f32.partialorder %v225_v62, 0.0  ;;  %v235_v51 = vld [vmem:[%s5251_s6 + $0x50] sm:$0xff] }
  0x40   : > { %4710 = vmatmul.mubr.msk.f32.gmra.mrb[6].mxu0 %vm348_vm1, %v5403_v55  ;;  %v1570_v31 = vrot.slane %v5403_v55, 1  ;;  %vm300_vm11 = vcmp.ge.f32.partialorder %v231_v18, 0.0  ;;  %v228_v54 = vld [vmem:[%s5251_s6 + $0x18] sm:$0x1]  ;;  %vm302_vm14 = vcmp.ge.f32.partialorder %v235_v51, 0.0 }
  0x41   : > { %4714 = vmatprep.mubr.msk.f32.mxu0 %vm348_vm1, %v1361_v56  ;;  %v5468_v56 = vsel %vm646_vm2, %v1377_v25, %v1378_v36  ;;  %v1551_v25 = vsel %vm646_vm2, %v1549_v30, %v1550_v58  ;;  %v1537_v36 = vsel %vm1521_vm3, %v288_v53, %v1529_v9  ;;  %v1558_v30 = vrot.slane %v5376_v24, 1  ;;  %v227_v58 = vld [vmem:[%s5251_s6 + $0x10] sm:$0xff] }
  0x42   : > { %v1562_v47 = vrot.slane %v1537_v36, 1  ;;  %v1532_v53 = vmul.f32 0.2, %v294_v8  ;;  %v306_v14 = vmul.f32 0.2, %v227_v58  ;;  %vm298_vm8 = vcmp.ge.f32.partialorder %v227_v58, 0.0 }
  0x43   : > { %v5529_v61 = vsel %vm646_vm2, %v1558_v30, %v1559_v46  ;;  %v5544_v33 = vsel %vm646_vm2, %v1564_v1, %v1565_v7  ;;  %v308_v30 = vmul.f32 0.2, %v231_v18  ;;  %v310_v1 = vmul.f32 0.2, %v235_v51 }
  0x44   : > { %4715 = vmatmul.mubr.msk.f32.vlgmr.msra.gmra.mrb[0].mxu0 %vm348_vm1, %v5418_v10  ;;  %v5532_v9 = vsel %vm646_vm2, %v1561_v42, %v1562_v47  ;;  %v1540_v12 = vsel %vm1524_vm7, %v294_v8, %v1532_v53  ;;  %6081 = vst [vmem:[#allocation4_spill] sm:$0xff] %v5544_v33  ;;  %v5551_v8 = vsel %vm298_vm8, %v227_v58, %v306_v14  ;;  %v226_v42 = vld [vmem:[%s5251_s6 + $0x8] sm:$0x1]  ;;  %v237_v53 = vld [vmem:[%s5251_s6 + $0x60] sm:$0xff]  ;;  %v623_v14 = vmul.f32 0.2, %v228_v54 }
  0x45   : > { %4727 = vmatpush3.msk.msra.mxu0 %vm373_vm0, %v5368_v22  ;;  %4717 = vmatprep.mubr.msk.f32.mxu0 %vm348_vm1, %v5425_v17  ;;  %v253_v22 = vld [vmem:[%s5251_s6 + $0xe0] sm:$0xff]  ;;  %6080 = vst [vmem:[#allocation3_spill] sm:$0xff] %v5532_v9  ;;  %v1571_v34 = vrot.slane %v1540_v12, 1  ;;  %v239_v12 = vld [vmem:[%s5251_s6 + $0x70] sm:$0xff]  ;;  %vm303_vm15 = vcmp.ge.f32.partialorder %v237_v53, 0.0  ;;  %vm615_vm3 = vcmp.ge.f32.partialorder %v228_v54, 0.0 }
  0x46   : > { %4740 = vmatprep.subr.msk.mxu0 %vm373_vm0, %v5433_v26  ;;  %vm327_vm13 = vcmp.ge.f32.partialorder %v253_v22, 0.0  ;;  %v335_v4 = vmul.f32 0.2, %v253_v22  ;;  %vm304_vm5 = vcmp.ge.f32.partialorder %v239_v12, 0.0 }
  0x47   : > { %v5570_v58 = vsel %vm646_vm2, %v1570_v31, %v1571_v34  ;;  %v5595_v34 = vsel %vm302_vm14, %v235_v51, %v310_v1 }
  0x48   : > { %4718 = vmatmul.mubr.msk.f32.gmra.mrb[2].mxu0 %vm348_vm1, %v5446_v35  ;;  %v5481_v15 = vsel %vm327_vm13, %v253_v22, %v335_v4  ;;  %v5505_v22 = vsel %vm646_vm2, %v1552_v40, %v1553_v21  ;;  %v229_v40 = vld [vmem:[%s5251_s6 + $0x20] sm:$0xff]  ;;  %v1567_v4 = vrot.slane %v5394_v43, 1  ;;  %v305_v21 = vmul.f32 0.2, %v225_v62  ;;  %6083 = vst [vmem:[#allocation6_spill] sm:$0xff] %v5570_v58 }
  0x49   : > { %4720 = vmatprep.mubr.msk.f32.mxu0 %vm348_vm1, %v5451_v41  ;;  %4637 = vmatmul.mubr.msk.f32.gmra.mrb[4].mxu1 %vm348_vm1, %v5481_v15  ;;  %vm299_vm10 = vcmp.ge.f32.partialorder %v229_v40, 0.0  ;;  %vm614_vm13 = vcmp.ge.f32.partialorder %v226_v42, 0.0 }
  0x4a   : > { %4639 = vmatprep.mubr.msk.f32.mxu1 %vm348_vm1, %v5488_v23  ;;  %v5546_v36 = vsel %vm297_vm9, %v225_v62, %v305_v21  ;;  %v5549_v29 = vsel %vm646_vm2, %v1567_v4, %v1568_v11  ;;  %v5575_v62 = vsel %vm300_vm11, %v231_v18, %v308_v30  ;;  %v622_v4 = vmul.f32 0.2, %v226_v42  ;;  %v232_v18 = vld [vmem:[%s5251_s6 + $0x38] sm:$0x1]  ;;  %v234_v21 = vld [vmem:[%s5251_s6 + $0x48] sm:$0x1] }
  0x4b   : > { %6082 = vst [vmem:[#allocation5_spill] sm:$0xff] %v5549_v29  ;;  %v311_v11 = vmul.f32 0.2, %v237_v53  ;;  %v312_v30 = vmul.f32 0.2, %v239_v12  ;;  %vm617_vm6 = vcmp.ge.f32.partialorder %v232_v18, 0.0 }
  0x4c   : > { %4721 = vmatmul.mubr.msk.f32.gmra.mrb[4].mxu0 %vm348_vm1, %v5462_v49  ;;  %v626_v51 = vmul.f32 0.2, %v234_v21  ;;  %vm618_vm7 = vcmp.ge.f32.partialorder %v234_v21, 0.0 }
  0x4d   : > { %4723 = vmatprep.mubr.msk.f32.mxu0 %vm348_vm1, %v5468_v56  ;;  %4640 = vmatmul.mubr.msk.f32.gmra.mrb[6].mxu1 %vm348_vm1, %v5499_v39 }
  0x4e   : > { %4644 = vmatprep.mubr.msk.f32.mxu1 %vm348_vm1, %v5546_v36 }
  0x50   : > { %4724 = vmatmul.mubr.msk.f32.gmra.mrb[6].mxu0 %vm348_vm1, %v5486_v20 }
  0x51   : > { %4728 = vmatprep.mubr.msk.f32.mxu0 %vm348_vm1, %v1551_v25  ;;  %v233_v25 = vld [vmem:[%s5251_s6 + $0x40] sm:$0xff]  ;;  %4645 = vmatmul.mubr.msk.f32.vlgmr.msra.gmra.mrb[0].mxu1 %vm348_vm1, %v5551_v8 }
  0x52   : > { %v309_v47 = vmul.f32 0.2, %v233_v25  ;;  %vm301_vm12 = vcmp.ge.f32.partialorder %v233_v25, 0.0  ;;  %4657 = vmatpush3.msk.msra.mxu1 %vm373_vm0, %v5411_v5 }
  0x53   : > { %4978 = vmatprep.subr.msk.mxu1 %vm373_vm0, %v5224_v0 }
  0x54   : > { %4729 = vmatmul.mubr.msk.f32.vlgmr.msra.gmra.mrb[0].mxu0 %vm348_vm1, %v5505_v22  ;;  %v5579_v7 = vsel %vm301_vm12, %v233_v25, %v309_v47  ;;  %v647_v25 = vrot.slane %v5546_v36, 1  ;;  %v5597_v47 = vsel %vm303_vm15, %v237_v53, %v311_v11  ;;  %v236_v53 = vld [vmem:[%s5251_s6 + $0x58] sm:$0x1]  ;;  %v650_v11 = vrot.slane %v5551_v8, 1 }
  0x55   : > { %4741 = vmatpush3.msk.msra.mxu0 %vm373_vm0, %v5433_v26  ;;  %4731 = vmatprep.mubr.msk.f32.mxu0 %vm348_vm1, %v5510_v45  ;;  %v307_v26 = vmul.f32 0.2, %v229_v40  ;;  %vm619_vm8 = vcmp.ge.f32.partialorder %v236_v53, 0.0 }
  0x56   : > { %4754 = vmatprep.subr.msk.mxu0 %vm373_vm0, %v5516_v60 }
  0x57   : > { %v5556_v46 = vsel %vm299_vm10, %v229_v40, %v307_v26  ;;  %v230_v40 = vld [vmem:[%s5251_s6 + $0x28] sm:$0x1]  ;;  %v630_v26 = vsel %vm614_vm13, %v226_v42, %v622_v4  ;;  %v631_v4 = vsel %vm615_vm3, %v228_v54, %v623_v14  ;;  %v241_v14 = vld [vmem:[%s5251_s6 + $0x80] sm:$0xff] }
  0x58   : > { %4732 = vmatmul.mubr.msk.f32.gmra.mrb[2].mxu0 %vm348_vm1, %v5529_v61  ;;  %4647 = vmatprep.mubr.msk.f32.mxu1 %vm348_vm1, %v5556_v46  ;;  %v624_v5 = vmul.f32 0.2, %v230_v40  ;;  %vm616_vm4 = vcmp.ge.f32.partialorder %v230_v40, 0.0  ;;  %v648_v31 = vrot.slane %v630_v26, 1  ;;  %v5602_v42 = vld [vmem:[%s6071_s1 + $0x28] sm:$0xf] }
  0x59   : > { %4734 = vmatprep.mubr.msk.f32.mxu0 %vm348_vm1, %v5532_v9  ;;  %4648 = vmatmul.mubr.msk.f32.gmra.mrb[2].mxu1 %vm348_vm1, %v5575_v62  ;;  %v238_v54 = vld [vmem:[%s5251_s6 + $0x68] sm:$0x1]  ;;  %vm1707_vm10 = vcmp.ge.f32.partialorder %v241_v14, 0.0 }
  0x5a   : > { %4650 = vmatprep.mubr.msk.f32.mxu1 %vm348_vm1, %v5579_v7  ;;  %v632_v36 = vsel %vm616_vm4, %v230_v40, %v624_v5  ;;  %v649_v1 = vsel %vm646_vm2, %v647_v25, %v648_v31  ;;  %v5619_v40 = vsel %vm304_vm5, %v239_v12, %v312_v30  ;;  %v651_v5 = vrot.slane %v631_v4, 1  ;;  %v240_v25 = vld [vmem:[%s5251_s6 + $0x78] sm:$0x1]  ;;  %v254_v9 = vld [vmem:[%s5251_s6 + $0xe8] sm:$0x1] }
  0x5b   : > { %v654_v26 = vrot.slane %v632_v36, 1  ;;  %v628_v12 = vmul.f32 0.2, %v238_v54  ;;  %v656_v31 = vrot.slane %v5575_v62, 1  ;;  %vm620_vm9 = vcmp.ge.f32.partialorder %v238_v54, 0.0 }
  0x5c   : > { %4735 = vmatmul.mubr.msk.f32.gmra.mrb[4].mxu0 %vm348_vm1, %v5544_v33  ;;  %v627_v33 = vmul.f32 0.2, %v236_v53  ;;  %v5638_v30 = vsel %vm646_vm2, %v650_v11, %v651_v5  ;;  %vm621_vm11 = vcmp.ge.f32.partialorder %v240_v25, 0.0  ;;  %vm810_vm13 = vcmp.ge.f32.partialorder %v254_v9, 0.0 }
  0x5d   : > { %4737 = vmatprep.mubr.msk.f32.mxu0 %vm348_vm1, %v5549_v29  ;;  %4651 = vmatmul.mubr.msk.f32.gmra.mrb[4].mxu1 %vm348_vm1, %v5595_v34 }
  0x5e   : > { %4653 = vmatprep.mubr.msk.f32.mxu1 %vm348_vm1, %v5597_v47 }
  0x60   : > { %4738 = vmatmul.mubr.msk.f32.gmra.mrb[6].mxu0 %vm348_vm1, %v5570_v58  ;;  %v625_v58 = vmul.f32 0.2, %v232_v18 }
  0x61   : > { %4742 = vmatprep.mubr.msk.f32.mxu0 %vm348_vm1, %v5551_v8  ;;  %4654 = vmatmul.mubr.msk.f32.gmra.mrb[6].mxu1 %vm348_vm1, %v5619_v40  ;;  %v634_v8 = vsel %vm618_vm7, %v234_v21, %v626_v51  ;;  %v629_v51 = vmul.f32 0.2, %v240_v25 }
  0x62   : > { %v633_v29 = vsel %vm617_vm6, %v232_v18, %v625_v58  ;;  %4658 = vmatprep.mubr.msk.f32.mxu1 %vm348_vm1, %v649_v1  ;;  %v252_v58 = vld [vmem:[%s5251_s6 + $0xd8] sm:$0x1]  ;;  %v659_v18 = vrot.slane %v5579_v7, 1  ;;  %v660_v36 = vrot.slane %v634_v8, 1  ;;  %v636_v1 = vsel %vm620_vm9, %v238_v54, %v628_v12 }
  0x63   : > { %v657_v21 = vrot.slane %v633_v29, 1  ;;  %vm809_vm12 = vcmp.ge.f32.partialorder %v252_v58, 0.0  ;;  %v665_v54 = vrot.slane %v5597_v47, 1  ;;  %v818_v8 = vmul.f32 0.2, %v254_v9 }
  0x64   : > { %4743 = vmatmul.mubr.msk.f32.vlgmr.msra.gmra.mrb[0].mxu0 %vm348_vm1, %v5556_v46  ;;  %v668_v12 = vrot.slane %v5619_v40, 1  ;;  %vm2734_vm9 = vcmask 64512  }
  0x65   : > { %4755 = vmatpush3.msk.msra.mxu0 %vm373_vm0, %v5516_v60  ;;  %4745 = vmatprep.mubr.msk.f32.mxu0 %vm348_vm1, %v5575_v62  ;;  %v653_v60 = vrot.slane %v5556_v46, 1  ;;  %v1708_v46 = vmul.f32 0.2, %v241_v14  ;;  %v635_v62 = vsel %vm619_vm8, %v236_v53, %v627_v33  ;;  %v256_v33 = vld [vmem:[%s5251_s6 + $0xf8] sm:$0x1]  ;;  %v662_v53 = vrot.slane %v5595_v34, 1 }
  0x66   : > { %4768 = vmatprep.subr.msk.mxu0 %vm373_vm0, %v5602_v42  ;;  %4659 = vmatmul.mubr.msk.f32.vlgmr.msra.gmra.mrb[0].mxu1 %vm348_vm1, %v5638_v30  ;;  %v5660_v11 = vsel %vm646_vm2, %v656_v31, %v657_v21  ;;  %v663_v5 = vrot.slane %v635_v62, 1  ;;  %vm811_vm14 = vcmp.ge.f32.partialorder %v256_v33, 0.0 }
  0x67   : > { %v5641_v4 = vsel %vm646_vm2, %v653_v60, %v654_v26  ;;  %v5652_v29 = vsel %vm1707_vm10, %v241_v14, %v1708_v46  ;;  %4979 = vmatpush3.msk.msra.mxu1 %vm373_vm0, %v5224_v0  ;;  %v5663_v60 = vsel %vm646_vm2, %v659_v18, %v660_v36  ;;  %v666_v26 = vrot.slane %v636_v1, 1 }
  0x68   : > { %4746 = vmatmul.mubr.msk.f32.gmra.mrb[2].mxu0 %vm348_vm1, %v5579_v7  ;;  %v817_v7 = vmul.f32 0.2, %v252_v58  ;;  %4661 = vmatprep.mubr.msk.f32.mxu1 %vm348_vm1, %v5641_v4  ;;  %v637_v14 = vsel %vm621_vm11, %v240_v25, %v629_v51  ;;  %v849_v25 = vrot.slane %v5473_v3, 1  ;;  %v664_v31 = vsel %vm646_vm2, %v662_v53, %v663_v5  ;;  %v259_v51 = vld [vmem:[%s5251_s6 + $0x110] sm:$0xff] }
  0x69   : > { %4748 = vmatprep.mubr.msk.f32.mxu0 %vm348_vm1, %v5595_v34  ;;  %v819_v34 = vmul.f32 0.2, %v256_v33  ;;  %v669_v46 = vrot.slane %v637_v14, 1  ;;  %v667_v18 = vsel %vm646_vm2, %v665_v54, %v666_v26  ;;  %v826_v36 = vsel %vm810_vm13, %v254_v9, %v818_v8  ;;  %v242_v14 = vld [vmem:[%s5251_s6 + $0x88] sm:$0x1] }
  0x6a   : > { %4662 = vmatmul.mubr.msk.f32.gmra.mrb[2].mxu1 %vm348_vm1, %v5660_v11  ;;  %v825_v0 = vsel %vm809_vm12, %v252_v58, %v817_v7  ;;  %v4268_v58 = vld [vmem:[%s6071_s1 + $0x2c] sm:$0xf]  ;;  %v853_v1 = vrot.slane %v826_v36, 1  ;;  %vm1831_vm3 = vcmp.ge.f32.partialorder %v259_v51, 0.0  ;;  %v1956_v8 = vmul.f32 0.2, %v242_v14 }
  0x6b   : > { %4664 = vmatprep.mubr.msk.f32.mxu1 %vm348_vm1, %v5663_v60  ;;  %v850_v21 = vrot.slane %v825_v0, 1  ;;  %v670_v9 = vsel %vm646_vm2, %v668_v12, %v669_v46  ;;  %vm1955_vm4 = vcmp.ge.f32.partialorder %v242_v14, 0.0  ;;  %v277_v12 = vld [vmem:[%s5251_s6 + $0x1a0] sm:$0xff]  ;;  %vm2736_vm10 = vcmask 58368  }
  0x6c   : > { %4749 = vmatmul.mubr.msk.f32.gmra.mrb[4].mxu0 %vm348_vm1, %v5597_v47  ;;  %v258_v47 = vld [vmem:[%s5251_s6 + $0x108] sm:$0x1]  ;;  %vm2209_vm6 = vcmp.ge.f32.partialorder %v277_v12, 0.0 }
  0x6d   : > { %4751 = vmatprep.mubr.msk.f32.mxu0 %vm348_vm1, %v5619_v40  ;;  %v820_v62 = vmul.f32 0.2, %v258_v47  ;;  %vm812_vm15 = vcmp.ge.f32.partialorder %v258_v47, 0.0  ;;  %v852_v40 = vrot.slane %v5481_v15, 1  ;;  %v851_v7 = vsel %vm646_vm2, %v849_v25, %v850_v21 }
  0x6e   : > { %4665 = vmatmul.mubr.msk.f32.gmra.mrb[4].mxu1 %vm348_vm1, %v664_v31 }
  0x6f   : > { %4667 = vmatprep.mubr.msk.f32.mxu1 %vm348_vm1, %v667_v18  ;;  %v828_v53 = vsel %vm812_vm15, %v258_v47, %v820_v62  ;;  %v854_v54 = vsel %vm646_vm2, %v852_v40, %v853_v1 }
  0x70   : > { %4752 = vmatmul.mubr.msk.f32.gmra.mrb[6].mxu0 %vm348_vm1, %v5652_v29  ;;  %v859_v5 = vrot.slane %v828_v53, 1 }
  0x71   : > { %4756 = vmatprep.mubr.msk.f32.mxu0 %vm348_vm1, %v5261_v19  ;;  %v827_v19 = vsel %vm811_vm14, %v256_v33, %v819_v34  ;;  %v260_v34 = vld [vmem:[%s5251_s6 + $0x118] sm:$0x1] }
  0x72   : > { %v856_v33 = vrot.slane %v827_v19, 1  ;;  %4668 = vmatmul.mubr.msk.f32.gmra.mrb[6].mxu1 %vm348_vm1, %v670_v9  ;;  %vm2082_vm5 = vcmp.ge.f32.partialorder %v260_v34, 0.0 }
  0x73   : > { %4678 = vmatprep.mubr.msk.f32.mxu1 %vm348_vm1, %v851_v7 }
  0x74   : > { %4757 = vmatmul.mubr.msk.f32.vlgmr.msra.gmra.mrb[0].mxu0 %vm348_vm1, %v5272_v28  ;;  %v855_v28 = vrot.slane %v5488_v23, 1 }
  0x75   : > { %4769 = vmatpush3.msk.msra.mxu0 %vm373_vm0, %v5602_v42  ;;  %4759 = vmatprep.mubr.msk.f32.mxu0 %vm348_vm1, %v5288_v38  ;;  %v1832_v38 = vmul.f32 0.2, %v259_v51  ;;  %v858_v42 = vrot.slane %v5499_v39, 1 }
  0x76   : > { %4782 = vmatprep.subr.msk.mxu0 %vm373_vm0, %v4268_v58  ;;  %v857_v26 = vsel %vm646_vm2, %v855_v28, %v856_v33  ;;  %4679 = vmatmul.mubr.msk.f32.vlgmr.msra.gmra.mrb[4].mxu1 %vm348_vm1, %v854_v54 }
  0x77   : > { %4681 = vmatprep.mubr.msk.f32.mxu1 %vm348_vm1, %v857_v26 }
  0x78   : > { %4760 = vmatmul.mubr.msk.f32.gmra.mrb[2].mxu0 %vm348_vm1, %v5473_v3  ;;  %v1833_v3 = vsel %vm1831_vm3, %v259_v51, %v1832_v38 }
  0x79   : > { %4762 = vmatprep.mubr.msk.f32.mxu0 %vm348_vm1, %v5481_v15  ;;  %v860_v15 = vsel %vm646_vm2, %v858_v42, %v859_v5 }
  0x7a   : > { %4682 = vmatmul.mubr.msk.f32.gmra.mrb[6].mxu1 %vm348_vm1, %v860_v15 }
  0x7c   : > { %4763 = vmatmul.mubr.msk.f32.gmra.mrb[4].mxu0 %vm348_vm1, %v5488_v23  ;;  %v4278_v23 = vld [vmem:[%s6071_s1 + $0x30] sm:$0xf] }
  0x7d   : > { %4765 = vmatprep.mubr.msk.f32.mxu0 %vm348_vm1, %v5499_v39  ;;  %v1957_v39 = vsel %vm1955_vm4, %v242_v14, %v1956_v8 }
  0x7e   : > { %v1960_v0 = vrot.slane %v1957_v39, 1 }
  0x80   : > { %4766 = vmatmul.mubr.msk.f32.gmra.mrb[6].mxu0 %vm348_vm1, %v1833_v3 }
  0x81   : > { %4770 = vmatprep.mubr.msk.f32.mxu0 %vm348_vm1, %v5638_v30  ;;  %v1959_v30 = vrot.slane %v5652_v29, 1  ;;  %v4288_v29 = vld [vmem:[%s6071_s1 + $0x34] sm:$0xf] }
  0x84   : > { %4771 = vmatmul.mubr.msk.f32.vlgmr.msra.gmra.mrb[0].mxu0 %vm348_vm1, %v5641_v4  ;;  %v1961_v4 = vsel %vm646_vm2, %v1959_v30, %v1960_v0 }
  0x85   : > { %4783 = vmatpush3.msk.msra.mxu0 %vm373_vm0, %v4268_v58  ;;  %4773 = vmatprep.mubr.msk.f32.mxu0 %vm348_vm1, %v5660_v11  ;;  %v2083_v11 = vmul.f32 0.2, %v260_v34 }
  0x86   : > { %4796 = vmatprep.subr.msk.mxu0 %vm373_vm0, %v4278_v23 }
  0x88   : > { %4774 = vmatmul.mubr.msk.f32.gmra.mrb[2].mxu0 %vm348_vm1, %v5663_v60  ;;  %v2084_v60 = vsel %vm2082_vm5, %v260_v34, %v2083_v11 }
  0x89   : > { %4776 = vmatprep.mubr.msk.f32.mxu0 %vm348_vm1, %v664_v31  ;;  %v2087_v47 = vrot.slane %v2084_v60, 1  ;;  %v2773_v31 = vld [vmem:[%s6073_s3] sm:$0xff] }
  0x8c   : > { %4777 = vmatmul.mubr.msk.f32.gmra.mrb[4].mxu0 %vm348_vm1, %v667_v18 }
  0x8d   : > { %4779 = vmatprep.mubr.msk.f32.mxu0 %vm348_vm1, %v670_v9  ;;  %v4318_v9 = vld [vmem:[%s6072_s2] ss:$0 sm:$0xff] }
  0x90   : > { %4780 = vmatmul.mubr.msk.f32.gmra.mrb[6].mxu0 %vm348_vm1, %v1961_v4 }
  0x91   : > { %4784 = vmatprep.mubr.msk.f32.mxu0 %vm348_vm1, %v5276_v32  ;;  %v2086_v32 = vrot.slane %v1833_v3, 1 }
  0x94   : > { %4785 = vmatmul.mubr.msk.f32.vlgmr.msra.gmra.mrb[0].mxu0 %vm348_vm1, %v5296_v44  ;;  %v2088_v44 = vsel %vm646_vm2, %v2086_v32, %v2087_v47 }
  0x95   : > { %4797 = vmatpush3.msk.msra.mxu0 %vm373_vm0, %v4278_v23  ;;  %4787 = vmatprep.mubr.msk.f32.mxu0 %vm348_vm1, %v5305_v48  ;;  %v4298_v48 = vld [vmem:[%s6071_s1 + $0x38] sm:$0xf] }
  0x96   : > { %4810 = vmatprep.subr.msk.mxu0 %vm373_vm0, %v4288_v29 }
  0x98   : > { %4788 = vmatmul.mubr.msk.f32.gmra.mrb[2].mxu0 %vm348_vm1, %v851_v7 }
  0x99   : > { %4790 = vmatprep.mubr.msk.f32.mxu0 %vm348_vm1, %v854_v54 }
  0x9c   : > { %4791 = vmatmul.mubr.msk.f32.gmra.mrb[4].mxu0 %vm348_vm1, %v857_v26 }
  0x9d   : > { %4793 = vmatprep.mubr.msk.f32.mxu0 %vm348_vm1, %v860_v15 }
  0xa0   : > { %4794 = vmatmul.mubr.msk.f32.gmra.mrb[6].mxu0 %vm348_vm1, %v2088_v44 }
  0xa1   : > { %4798 = vmatprep.mubr.msk.f32.mxu0 %vm348_vm1, %v5312_v50  ;;  %v2210_v50 = vmul.f32 0.2, %v277_v12 }
  0xa4   : > { %4799 = vmatmul.mubr.msk.f32.vlgmr.msra.gmra.mrb[0].mxu0 %vm348_vm1, %v5314_v52  ;;  %v2211_v52 = vsel %vm2209_vm6, %v277_v12, %v2210_v50 }
  0xa5   : > { %4811 = vmatpush3.msk.msra.mxu0 %vm373_vm0, %v4288_v29  ;;  %4801 = vmatprep.mubr.msk.f32.mxu0 %vm348_vm1, %v5326_v57  ;;  %v4308_v57 = vld [vmem:[%s6071_s1 + $0x3c] sm:$0xf] }
  0xa6   : > { %4824 = vmatprep.subr.msk.mxu0 %vm373_vm0, %v4298_v48 }
  0xa8   : > { %4802 = vmatmul.mubr.msk.f32.gmra.mrb[2].mxu0 %vm348_vm1, %v5328_v59  ;;  %v295_v59 = vld [vmem:[%s5251_s6 + $0x230] sm:$0xff] }
  0xa9   : > { %4804 = vmatprep.mubr.msk.f32.mxu0 %vm348_vm1, %v5337_v63  ;;  %v2334_v63 = vmul.f32 0.2, %v295_v59  ;;  %vm2333_vm7 = vcmp.ge.f32.partialorder %v295_v59, 0.0 }
  0xac   : > { %4805 = vmatmul.mubr.msk.f32.gmra.mrb[4].mxu0 %vm348_vm1, %v5339_v2  ;;  %v2335_v2 = vsel %vm2333_vm7, %v295_v59, %v2334_v63 }
  0xad   : > { %4807 = vmatprep.mubr.msk.f32.mxu0 %vm348_vm1, %v5347_v6  ;;  %v278_v6 = vld [vmem:[%s5251_s6 + $0x1a8] sm:$0x1] }
  0xae   : > { %vm2457_vm8 = vcmp.ge.f32.partialorder %v278_v6, 0.0 }
  0xb0   : > { %4808 = vmatmul.mubr.msk.f32.gmra.mrb[6].mxu0 %vm348_vm1, %v2211_v52 }
  0xb1   : > { %4812 = vmatprep.mubr.msk.f32.mxu0 %vm348_vm1, %v5358_v13  ;;  %v2458_v13 = vmul.f32 0.2, %v278_v6 }
  0xb4   : > { %4813 = vmatmul.mubr.msk.f32.vlgmr.msra.gmra.mrb[0].mxu0 %vm348_vm1, %v5361_v16  ;;  %v2459_v16 = vsel %vm2457_vm8, %v278_v6, %v2458_v13 }
  0xb5   : > { %4825 = vmatpush3.msk.msra.mxu0 %vm373_vm0, %v4298_v48  ;;  %4815 = vmatprep.mubr.msk.f32.mxu0 %vm348_vm1, %v5376_v24  ;;  %v2461_v24 = vrot.slane %v2211_v52, 1  ;;  %v4336_v52 = vld [vmem:[%s6073_s3 + $0x10] sm:$0xff] }
  0xb6   : > { %4838 = vmatprep.subr.msk.mxu0 %vm373_vm0, %v4308_v57 }
  0xb8   : > { %4816 = vmatmul.mubr.msk.f32.gmra.mrb[2].mxu0 %vm348_vm1, %v5378_v27  ;;  %v2462_v27 = vrot.slane %v2459_v16, 1 }
  0xb9   : > { %4818 = vmatprep.mubr.msk.f32.mxu0 %vm348_vm1, %v5391_v37 }
  0xba   : > { %v2463_v37 = vsel %vm646_vm2, %v2461_v24, %v2462_v27 }
  0xbc   : > { %4819 = vmatmul.mubr.msk.f32.gmra.mrb[4].mxu0 %vm348_vm1, %v5394_v43  ;;  %v296_v43 = vld [vmem:[%s5251_s6 + $0x238] sm:$0x1] }
  0xbd   : > { %4821 = vmatprep.mubr.msk.f32.mxu0 %vm348_vm1, %v5403_v55  ;;  %v2585_v55 = vmul.f32 0.2, %v296_v43 }
  0xc0   : > { %4822 = vmatmul.mubr.msk.f32.gmra.mrb[6].mxu0 %vm348_vm1, %v2335_v2 }
  0xc1   : > { %4826 = vmatprep.mubr.msk.f32.mxu0 %vm348_vm1, %v5418_v10 }
  0xc4   : > { %4827 = vmatmul.mubr.msk.f32.vlgmr.msra.gmra.mrb[0].mxu0 %vm348_vm1, %v5425_v17  ;;  %v6084_v17 = vld [vmem:[#allocation3_spill] sm:$0xff] }
  0xc5   : > { %4839 = vmatpush3.msk.msra.mxu0 %vm373_vm0, %v4308_v57  ;;  %4829 = vmatprep.mubr.msk.f32.mxu0 %vm348_vm1, %v5446_v35  ;;  %vm2584_vm0 = vcmp.ge.f32.partialorder %v296_v43, 0.0  ;;  %v2588_v35 = vrot.slane %v2335_v2, 1 }
  0xc6   : > { %v2586_v10 = vsel %vm2584_vm0, %v296_v43, %v2585_v55  ;;  %v4345_v55 = vld [vmem:[%s6073_s3 + $0x18] sm:$0xff] }
  0xc8   : > { %4830 = vmatmul.mubr.msk.f32.gmra.mrb[2].mxu0 %vm348_vm1, %v5451_v41  ;;  %v6085_v41 = vld [vmem:[#allocation4_spill] sm:$0xff] }
  0xc9   : > { %4832 = vmatprep.mubr.msk.f32.mxu0 %vm348_vm1, %v5462_v49  ;;  %v2589_v49 = vrot.slane %v2586_v10, 1 }
  0xcc   : > { %4833 = vmatmul.mubr.msk.f32.gmra.mrb[4].mxu0 %vm348_vm1, %v5468_v56  ;;  %v6086_v56 = vld [vmem:[#allocation5_spill] sm:$0xff] }
  0xcd   : > { %4835 = vmatprep.mubr.msk.f32.mxu0 %vm348_vm1, %v5486_v20  ;;  %v6087_v20 = vld [vmem:[#allocation6_spill] sm:$0xff] }
  0xd0   : > { %4836 = vmatmul.mubr.msk.f32.gmra.mrb[6].mxu0 %vm348_vm1, %v2463_v37 }
  0xd1   : > { %4840 = vmatprep.mubr.msk.f32.mxu0 %vm348_vm1, %v5505_v22  ;;  %v2590_v22 = vsel %vm646_vm2, %v2588_v35, %v2589_v49 }
  0xd4   : > { %4841 = vmatmul.mubr.msk.f32.vlgmr.msra.gmra.mrb[0].mxu0 %vm348_vm1, %v5510_v45  ;;  %v5182_v45 = vmov 0.0  }
  0xd5   : > { %4843 = vmatprep.mubr.msk.f32.mxu0 %vm348_vm1, %v5529_v61  ;;  %2740 = vst.msk [vmem:[#allocation2 + $0x20] sm:$0xff] %vm2734_vm9, %v5182_v45  ;;  %2735 = vst.msk [vmem:[#allocation2] sm:$0xff] %vm2734_vm9, %v5182_v45  ;;  %v4319_v61 = vld [vmem:[%s6073_s3 + $0x8] sm:$0xff] }
  0xd6   : > { %2741 = vst.msk [vmem:[#allocation2 + $0x28] sm:$0x3] %vm2736_vm10, %v5182_v45  ;;  %2737 = vst.msk [vmem:[#allocation2 + $0x8] sm:$0x3] %vm2736_vm10, %v5182_v45  ;;  %4852 = vmatprep.subr.mxu1 %v4319_v61 }
  0xd7   : > { %2738 = vst.msk [vmem:[#allocation2 + $0x10] sm:$0xff] %vm2734_vm9, %v5182_v45  ;;  %2742 = vst.msk [vmem:[#allocation2 + $0x30] sm:$0xff] %vm2734_vm9, %v5182_v45  ;;  %4853 = vmatpush3.msra.mxu1 %v4319_v61 }
  0xd8   : > { %4844 = vmatmul.mubr.msk.f32.gmra.mrb[2].mxu0 %vm348_vm1, %v6084_v17  ;;  %2739 = vst.msk [vmem:[#allocation2 + $0x18] sm:$0x3] %vm2736_vm10, %v5182_v45  ;;  %2743 = vst.msk [vmem:[#allocation2 + $0x38] sm:$0x3] %vm2736_vm10, %v5182_v45  ;;  %4866 = vmatprep.subr.mxu1 %v2773_v31 }
  0xd9   : > { %4846 = vmatprep.mubr.msk.f32.mxu0 %vm348_vm1, %v6085_v41  ;;  %2744 = vst.msk [vmem:[#allocation2 + $0x40] sm:$0xff] %vm2734_vm9, %v5182_v45  ;;  %2746 = vst.msk [vmem:[#allocation2 + $0x50] sm:$0xff] %vm2734_vm9, %v5182_v45 }
  0xda   : > { %2745 = vst.msk [vmem:[#allocation2 + $0x48] sm:$0x3] %vm2736_vm10, %v5182_v45  ;;  %2747 = vst.msk [vmem:[#allocation2 + $0x58] sm:$0x3] %vm2736_vm10, %v5182_v45 }
  0xdb   : > { %2748 = vst.msk [vmem:[#allocation2 + $0x60] sm:$0xff] %vm2734_vm9, %v5182_v45  ;;  %2750 = vst.msk [vmem:[#allocation2 + $0x70] sm:$0xff] %vm2734_vm9, %v5182_v45 }
  0xdc   : > { %4847 = vmatmul.mubr.msk.f32.gmra.mrb[4].mxu0 %vm348_vm1, %v6086_v56  ;;  %2749 = vst.msk [vmem:[#allocation2 + $0x68] sm:$0x3] %vm2736_vm10, %v5182_v45  ;;  %2751 = vst.msk [vmem:[#allocation2 + $0x78] sm:$0x3] %vm2736_vm10, %v5182_v45  ;;  %v2765_v27 = vld [vmem:[#allocation2] sm:$0xff] }
  0xdd   : > { %4849 = vmatprep.mubr.msk.f32.mxu0 %vm348_vm1, %v6087_v20  ;;  %2752 = vst.msk [vmem:[#allocation2 + $0x80] sm:$0xff] %vm2734_vm9, %v5182_v45  ;;  %2754 = vst.msk [vmem:[#allocation2 + $0x90] sm:$0xff] %vm2734_vm9, %v5182_v45  ;;  %v2774_v25 = vld [vmem:[#allocation2 + $0x1] sm:$0xff] }
  0xde   : > { %2753 = vst.msk [vmem:[#allocation2 + $0x88] sm:$0x3] %vm2736_vm10, %v5182_v45  ;;  %2755 = vst.msk [vmem:[#allocation2 + $0x98] sm:$0x3] %vm2736_vm10, %v5182_v45  ;;  %4854 = vmatprep.mubr.msk.f32.mxu1 %vm2734_vm9, %v2774_v25  ;;  %v3042_v56 = vld [vmem:[#allocation2 + $0x2] sm:$0xff] }
  0xdf   : > { %v4354_v45 = vld [vmem:[%s6073_s3 + $0x20] sm:$0xff] }
  0xe0   : > { %4850 = vmatmul.mubr.msk.f32.gmra.mrb[6].mxu0 %vm348_vm1, %v2590_v22  ;;  %vm4087_vm1 = vcmask 130048  }
 0x139   : > { %v4660_v46 = vpop.f32.mrb[0].mxu1 }
 0x13a   : > { %v758_v58 = vpop.f32.mrb[1].mxu1 }
 0x13d   : > { %v4663_v18 = vpop.f32.mrb[2].mxu1 }
 0x13e   : > { %v768_v21 = vpop.f32.mrb[3].mxu1 }
 0x149   : > { %v4680_v36 = vpop.f32.mrb[4].mxu1 }
 0x14a   : > { %v968_v62 = vpop.f32.mrb[5].mxu1 }
 0x14d   : > { %v4683_v19 = vpop.f32.mrb[6].mxu1 }
 0x14e   : > { %v978_v40 = vpop.f32.mrb[7].mxu1 }
 0x1a7   : > { %v4842_v51 = vpop.f32.mrb[0].mxu0 }
 0x1a8   : > { %v4980_v1 = vadd.f32 %v4842_v51, %v4660_v46  ;;  %v2664_v28 = vpop.f32.mrb[1].mxu0 }
 0x1a9   : > { %v4981_v7 = vadd.f32 %v2664_v28, %v758_v58  ;;  %v3785_v28 = vld [vmem:[#allocation2 + $0x91] sm:$0xff] }
 0x1aa   : > { %v2719_v33 = vadd.f32 %v4980_v1, %v4318_v9  ;;  %v3638_v1 = vld [vmem:[#allocation2 + $0x90] sm:$0xff] }
 0x1ab   : > { %v2718_v53 = vadd.f32 %v4981_v7, %v4318_v9  ;;  %v4845_v38 = vpop.f32.mrb[2].mxu0  ;;  %v3932_v7 = vld [vmem:[#allocation2 + $0x92] sm:$0xff] }
 0x1ac   : > { %v2727_v42 = vmax.f32 %v2719_v33, 0.0  ;;  %v4982_v54 = vadd.f32 %v4845_v38, %v4663_v18  ;;  %v2674_v5 = vpop.f32.mrb[3].mxu0  ;;  %v4399_v33 = vld [vmem:[%s6074_s4] ss:$0 sm:$0xff] }
 0x1ad   : > { %v2726_v26 = vmax.f32 %v2718_v53, 0.0  ;;  %v4983_v3 = vadd.f32 %v2674_v5, %v768_v21  ;;  %v4363_v21 = vld [vmem:[%s6073_s3 + $0x28] sm:$0xff] }
 0x1ae   : > { %2758 = vst.msk [vmem:[#allocation2 + $0x21] sm:$0xff] %vm2734_vm9, %v2727_v42  ;;  %v2721_v15 = vadd.f32 %v4982_v54, %v4318_v9 }
 0x1af   : > { %2757 = vst.msk [vmem:[#allocation2 + $0x11] sm:$0xff] %vm2734_vm9, %v2726_v26  ;;  %v2720_v14 = vadd.f32 %v4983_v3, %v4318_v9  ;;  %v4848_v8 = vpop.f32.mrb[4].mxu0 }
 0x1b0   : > { %v2729_v23 = vmax.f32 %v2721_v15, 0.0  ;;  %v4984_v39 = vadd.f32 %v4848_v8, %v4680_v36  ;;  %v2684_v30 = vpop.f32.mrb[5].mxu0 }
 0x1b1   : > { %v2728_v0 = vmax.f32 %v2720_v14, 0.0  ;;  %v4985_v4 = vadd.f32 %v2684_v30, %v968_v62  ;;  %v4372_v62 = vld [vmem:[%s6073_s3 + $0x30] sm:$0xff] }
 0x1b2   : > { %2760 = vst.msk [vmem:[#allocation2 + $0x41] sm:$0xff] %vm2734_vm9, %v2729_v23  ;;  %v2723_v34 = vadd.f32 %v4984_v39, %v4318_v9 }
 0x1b3   : > { %2759 = vst.msk [vmem:[#allocation2 + $0x31] sm:$0xff] %vm2734_vm9, %v2728_v0  ;;  %v2722_v11 = vadd.f32 %v4985_v4, %v4318_v9  ;;  %v4851_v29 = vpop.f32.mrb[6].mxu0 }
 0x1b4   : > { %v2731_v60 = vmax.f32 %v2723_v34, 0.0  ;;  %v4986_v32 = vadd.f32 %v4851_v29, %v4683_v19  ;;  %v2694_v47 = vpop.f32.mrb[7].mxu0 }
 0x1b5   : > { %v2730_v44 = vmax.f32 %v2722_v11, 0.0  ;;  %v4987_v48 = vadd.f32 %v2694_v47, %v978_v40  ;;  %v5871_v59 = vld [vmem:[#allocation2 + $0x21] sm:$0xff]  ;;  %v4381_v40 = vld [vmem:[%s6073_s3 + $0x38] sm:$0xff] }
 0x1b6   : > { %2762 = vst.msk [vmem:[#allocation2 + $0x61] sm:$0xff] %vm2734_vm9, %v2731_v60  ;;  %v2725_v12 = vadd.f32 %v4986_v32, %v4318_v9  ;;  %v5863_v50 = vld [vmem:[#allocation2 + $0x11] sm:$0xff]  ;;  %v5902_v10 = vld [vmem:[#allocation2 + $0x20] sm:$0xff] }
 0x1b7   : > { %2761 = vst.msk [vmem:[#allocation2 + $0x51] sm:$0xff] %vm2734_vm9, %v2730_v44  ;;  %v2724_v57 = vadd.f32 %v4987_v48, %v4318_v9  ;;  %4855 = vmatmul.mubr.msk.f32.vlgmr.msra.gmra.mrb[8].mxu1 %vm2734_vm9, %v5863_v50  ;;  %v2766_v43 = vld [vmem:[#allocation2 + $0x10] sm:$0xff]  ;;  %v5931_v61 = vld [vmem:[#allocation2 + $0x22] sm:$0xff] }
 0x1b8   : > { %v2733_v63 = vmax.f32 %v2725_v12, 0.0  ;;  %4867 = vmatpush3.msra.mxu1 %v2773_v31  ;;  %4857 = vmatprep.mubr.msk.f32.mxu1 %vm2734_vm9, %v5871_v59  ;;  %v3043_v22 = vld [vmem:[#allocation2 + $0x12] sm:$0xff]  ;;  %v4390_v9 = vld [vmem:[%s6073_s3 + $0x40] sm:$0xff] }
 0x1b9   : > { %v2732_v2 = vmax.f32 %v2724_v57, 0.0  ;;  %4880 = vmatprep.subr.mxu1 %v4336_v52  ;;  %v5881_v13 = vld [vmem:[#allocation2 + $0x41] sm:$0xff] }
 0x1ba   : > { %2764 = vst.msk [vmem:[#allocation2 + $0x81] sm:$0xff] %vm2734_vm9, %v2733_v63  ;;  %v5876_v6 = vld [vmem:[#allocation2 + $0x31] sm:$0xff]  ;;  %v5910_v35 = vld [vmem:[#allocation2 + $0x40] sm:$0xff] }
 0x1bb   : > { %2763 = vst.msk [vmem:[#allocation2 + $0x71] sm:$0xff] %vm2734_vm9, %v2732_v2  ;;  %4858 = vmatmul.mubr.msk.f32.gmra.mrb[10].mxu1 %vm2734_vm9, %v5876_v6  ;;  %v5906_v17 = vld [vmem:[#allocation2 + $0x30] sm:$0xff]  ;;  %v5939_v31 = vld [vmem:[#allocation2 + $0x42] sm:$0xff] }
 0x1bc   : > { %4860 = vmatprep.mubr.msk.f32.mxu1 %vm2734_vm9, %v5881_v13  ;;  %v5935_v25 = vld [vmem:[#allocation2 + $0x32] sm:$0xff] }
 0x1bd   : > { %v5889_v24 = vld [vmem:[#allocation2 + $0x61] sm:$0xff] }
 0x1be   : > { %v5885_v16 = vld [vmem:[#allocation2 + $0x51] sm:$0xff]  ;;  %v5918_v49 = vld [vmem:[#allocation2 + $0x60] sm:$0xff] }
 0x1bf   : > { %4861 = vmatmul.mubr.msk.f32.gmra.mrb[12].mxu1 %vm2734_vm9, %v5885_v16  ;;  %v5914_v41 = vld [vmem:[#allocation2 + $0x50] sm:$0xff]  ;;  %v5947_v58 = vld [vmem:[#allocation2 + $0x62] sm:$0xff] }
 0x1c0   : > { %4863 = vmatprep.mubr.msk.f32.mxu1 %vm2734_vm9, %v5889_v24  ;;  %v5943_v46 = vld [vmem:[#allocation2 + $0x52] sm:$0xff] }
 0x1c1   : > { %v3196_v36 = vld [vmem:[#allocation2 + $0x80] sm:$0xff] }
 0x1c2   : > { %v5893_v37 = vld [vmem:[#allocation2 + $0x71] sm:$0xff]  ;;  %v3343_v19 = vld [vmem:[#allocation2 + $0x81] sm:$0xff] }
 0x1c3   : > { %4864 = vmatmul.mubr.msk.f32.gmra.mrb[14].mxu1 %vm2734_vm9, %v5893_v37  ;;  %v5922_v20 = vld [vmem:[#allocation2 + $0x70] sm:$0xff]  ;;  %v3490_v51 = vld [vmem:[#allocation2 + $0x82] sm:$0xff] }
 0x1c4   : > { %4868 = vmatprep.mubr.msk.f32.mxu1 %vm2734_vm9, %v2765_v27  ;;  %v5951_v18 = vld [vmem:[#allocation2 + $0x72] sm:$0xff] }
 0x1c7   : > { %4869 = vmatmul.mubr.msk.f32.vlgmr.msra.gmra.mrb[8].mxu1 %vm2734_vm9, %v2766_v43 }
 0x1c8   : > { %4881 = vmatpush3.msra.mxu1 %v4336_v52  ;;  %4871 = vmatprep.mubr.msk.f32.mxu1 %vm2734_vm9, %v5902_v10 }
 0x1c9   : > { %4894 = vmatprep.subr.mxu1 %v4345_v55 }
 0x1cb   : > { %4872 = vmatmul.mubr.msk.f32.gmra.mrb[10].mxu1 %vm2734_vm9, %v5906_v17 }
 0x1cc   : > { %4874 = vmatprep.mubr.msk.f32.mxu1 %vm2734_vm9, %v5910_v35 }
 0x1cf   : > { %4875 = vmatmul.mubr.msk.f32.gmra.mrb[12].mxu1 %vm2734_vm9, %v5914_v41 }
 0x1d0   : > { %4877 = vmatprep.mubr.msk.f32.mxu1 %vm2734_vm9, %v5918_v49 }
 0x1d3   : > { %4878 = vmatmul.mubr.msk.f32.gmra.mrb[14].mxu1 %vm2734_vm9, %v5922_v20 }
 0x1d4   : > { %4882 = vmatprep.mubr.msk.f32.mxu1 %vm2734_vm9, %v3042_v56 }
 0x1d7   : > { %4883 = vmatmul.mubr.msk.f32.vlgmr.msra.gmra.mrb[8].mxu1 %vm2734_vm9, %v3043_v22 }
 0x1d8   : > { %4895 = vmatpush3.msra.mxu1 %v4345_v55  ;;  %4885 = vmatprep.mubr.msk.f32.mxu1 %vm2734_vm9, %v5931_v61 }
 0x1d9   : > { %4908 = vmatprep.subr.mxu1 %v4354_v45 }
 0x1db   : > { %4886 = vmatmul.mubr.msk.f32.gmra.mrb[10].mxu1 %vm2734_vm9, %v5935_v25 }
 0x1dc   : > { %4888 = vmatprep.mubr.msk.f32.mxu1 %vm2734_vm9, %v5939_v31 }
 0x1df   : > { %4889 = vmatmul.mubr.msk.f32.gmra.mrb[12].mxu1 %vm2734_vm9, %v5943_v46 }
 0x1e0   : > { %4891 = vmatprep.mubr.msk.f32.mxu1 %vm2734_vm9, %v5947_v58 }
 0x1e3   : > { %4892 = vmatmul.mubr.msk.f32.gmra.mrb[14].mxu1 %vm2734_vm9, %v5951_v18 }
 0x1e4   : > { %4896 = vmatprep.mubr.msk.f32.mxu1 %vm2734_vm9, %v2766_v43 }
 0x1e7   : > { %4897 = vmatmul.mubr.msk.f32.vlgmr.msra.gmra.mrb[8].mxu1 %vm2734_vm9, %v5902_v10 }
 0x1e8   : > { %4909 = vmatpush3.msra.mxu1 %v4354_v45  ;;  %4899 = vmatprep.mubr.msk.f32.mxu1 %vm2734_vm9, %v5906_v17 }
 0x1e9   : > { %4922 = vmatprep.subr.mxu1 %v4363_v21 }
 0x1eb   : > { %4900 = vmatmul.mubr.msk.f32.gmra.mrb[10].mxu1 %vm2734_vm9, %v5910_v35 }
 0x1ec   : > { %4902 = vmatprep.mubr.msk.f32.mxu1 %vm2734_vm9, %v5914_v41 }
 0x1ef   : > { %4903 = vmatmul.mubr.msk.f32.gmra.mrb[12].mxu1 %vm2734_vm9, %v5918_v49 }
 0x1f0   : > { %4905 = vmatprep.mubr.msk.f32.mxu1 %vm2734_vm9, %v5922_v20 }
 0x1f3   : > { %4906 = vmatmul.mubr.msk.f32.gmra.mrb[14].mxu1 %vm2734_vm9, %v3196_v36 }
 0x1f4   : > { %4910 = vmatprep.mubr.msk.f32.mxu1 %vm2734_vm9, %v5863_v50 }
 0x1f7   : > { %4911 = vmatmul.mubr.msk.f32.vlgmr.msra.gmra.mrb[8].mxu1 %vm2734_vm9, %v5871_v59 }
 0x1f8   : > { %4923 = vmatpush3.msra.mxu1 %v4363_v21  ;;  %4913 = vmatprep.mubr.msk.f32.mxu1 %vm2734_vm9, %v5876_v6 }
 0x1f9   : > { %4936 = vmatprep.subr.mxu1 %v4372_v62 }
 0x1fb   : > { %4914 = vmatmul.mubr.msk.f32.gmra.mrb[10].mxu1 %vm2734_vm9, %v5881_v13 }
 0x1fc   : > { %4916 = vmatprep.mubr.msk.f32.mxu1 %vm2734_vm9, %v5885_v16 }
 0x1ff   : > { %4917 = vmatmul.mubr.msk.f32.gmra.mrb[12].mxu1 %vm2734_vm9, %v5889_v24 }
 0x200   : > { %4919 = vmatprep.mubr.msk.f32.mxu1 %vm2734_vm9, %v5893_v37 }
 0x203   : > { %4920 = vmatmul.mubr.msk.f32.gmra.mrb[14].mxu1 %vm2734_vm9, %v3343_v19 }
 0x204   : > { %4924 = vmatprep.mubr.msk.f32.mxu1 %vm2734_vm9, %v3043_v22 }
 0x207   : > { %4925 = vmatmul.mubr.msk.f32.vlgmr.msra.gmra.mrb[8].mxu1 %vm2734_vm9, %v5931_v61 }
 0x208   : > { %4937 = vmatpush3.msra.mxu1 %v4372_v62  ;;  %4927 = vmatprep.mubr.msk.f32.mxu1 %vm2734_vm9, %v5935_v25 }
 0x209   : > { %4950 = vmatprep.subr.mxu1 %v4381_v40 }
 0x20b   : > { %4928 = vmatmul.mubr.msk.f32.gmra.mrb[10].mxu1 %vm2734_vm9, %v5939_v31 }
 0x20c   : > { %4930 = vmatprep.mubr.msk.f32.mxu1 %vm2734_vm9, %v5943_v46 }
 0x20f   : > { %4931 = vmatmul.mubr.msk.f32.gmra.mrb[12].mxu1 %vm2734_vm9, %v5947_v58 }
 0x210   : > { %4933 = vmatprep.mubr.msk.f32.mxu1 %vm2734_vm9, %v5951_v18 }
 0x213   : > { %4934 = vmatmul.mubr.msk.f32.gmra.mrb[14].mxu1 %vm2734_vm9, %v3490_v51 }
 0x214   : > { %4938 = vmatprep.mubr.msk.f32.mxu1 %vm2734_vm9, %v5902_v10 }
 0x217   : > { %4939 = vmatmul.mubr.msk.f32.vlgmr.msra.gmra.mrb[8].mxu1 %vm2734_vm9, %v5906_v17 }
 0x218   : > { %4951 = vmatpush3.msra.mxu1 %v4381_v40  ;;  %4941 = vmatprep.mubr.msk.f32.mxu1 %vm2734_vm9, %v5910_v35 }
 0x219   : > { %4964 = vmatprep.subr.mxu1 %v4390_v9 }
 0x21b   : > { %4942 = vmatmul.mubr.msk.f32.gmra.mrb[10].mxu1 %vm2734_vm9, %v5914_v41 }
 0x21c   : > { %4944 = vmatprep.mubr.msk.f32.mxu1 %vm2734_vm9, %v5918_v49 }
 0x21f   : > { %4945 = vmatmul.mubr.msk.f32.gmra.mrb[12].mxu1 %vm2734_vm9, %v5922_v20 }
 0x220   : > { %4947 = vmatprep.mubr.msk.f32.mxu1 %vm2734_vm9, %v3196_v36 }
 0x223   : > { %4948 = vmatmul.mubr.msk.f32.gmra.mrb[14].mxu1 %vm2734_vm9, %v3638_v1 }
 0x224   : > { %4952 = vmatprep.mubr.msk.f32.mxu1 %vm2734_vm9, %v5871_v59 }
 0x227   : > { %4953 = vmatmul.mubr.msk.f32.vlgmr.msra.gmra.mrb[8].mxu1 %vm2734_vm9, %v5876_v6 }
 0x228   : > { %4965 = vmatpush3.msra.mxu1 %v4390_v9  ;;  %4955 = vmatprep.mubr.msk.f32.mxu1 %vm2734_vm9, %v5881_v13 }
 0x22b   : > { %4956 = vmatmul.mubr.msk.f32.gmra.mrb[10].mxu1 %vm2734_vm9, %v5885_v16 }
 0x22c   : > { %4958 = vmatprep.mubr.msk.f32.mxu1 %vm2734_vm9, %v5889_v24 }
 0x22f   : > { %4959 = vmatmul.mubr.msk.f32.gmra.mrb[12].mxu1 %vm2734_vm9, %v5893_v37 }
 0x230   : > { %4961 = vmatprep.mubr.msk.f32.mxu1 %vm2734_vm9, %v3343_v19 }
 0x233   : > { %4962 = vmatmul.mubr.msk.f32.gmra.mrb[14].mxu1 %vm2734_vm9, %v3785_v28 }
 0x234   : > { %4966 = vmatprep.mubr.msk.f32.mxu1 %vm2734_vm9, %v5931_v61 }
 0x237   : > { %4967 = vmatmul.mubr.msk.f32.vlgmr.msra.gmra.mrb[8].mxu1 %vm2734_vm9, %v5935_v25 }
 0x238   : > { %4969 = vmatprep.mubr.msk.f32.mxu1 %vm2734_vm9, %v5939_v31 }
 0x23b   : > { %4970 = vmatmul.mubr.msk.f32.gmra.mrb[10].mxu1 %vm2734_vm9, %v5943_v46 }
 0x23c   : > { %4972 = vmatprep.mubr.msk.f32.mxu1 %vm2734_vm9, %v5947_v58 }
 0x23f   : > { %4973 = vmatmul.mubr.msk.f32.gmra.mrb[12].mxu1 %vm2734_vm9, %v5951_v18 }
 0x240   : > { %4975 = vmatprep.mubr.msk.f32.mxu1 %vm2734_vm9, %v3490_v51 }
 0x243   : > { %4976 = vmatmul.mubr.msk.f32.gmra.mrb[14].mxu1 %vm2734_vm9, %v3932_v7 }
 0x30a   : > { %v4968_v53 = vpop.f32.mrb[8].mxu1 }
 0x30b   : > { %v4080_v38 = vadd.f32 %v4968_v53, %v4399_v33  ;;  %v4025_v42 = vpop.f32.mrb[9].mxu1 }
 0x30c   : > { %v4079_v54 = vadd.f32 %v4399_v33, %v4025_v42 }
 0x30d   : > { %4089 = vst.msk [vmem:[%s224_s10 + $0x8] sm:$0xff] %vm4087_vm1, %v4080_v38 }
 0x30e   : > { %4088 = vst.msk [vmem:[%s224_s10] sm:$0xff] %vm4087_vm1, %v4079_v54  ;;  %v4971_v5 = vpop.f32.mrb[10].mxu1 }
 0x30f   : > { %v4082_v26 = vadd.f32 %v4971_v5, %v4399_v33  ;;  %v4035_v3 = vpop.f32.mrb[11].mxu1 }
 0x310   : > { %v4081_v15 = vadd.f32 %v4399_v33, %v4035_v3 }
 0x311   : > { %4091 = vst.msk [vmem:[%s224_s10 + $0x18] sm:$0xff] %vm4087_vm1, %v4082_v26 }
 0x312   : > { %4090 = vst.msk [vmem:[%s224_s10 + $0x10] sm:$0xff] %vm4087_vm1, %v4081_v15  ;;  %v4974_v14 = vpop.f32.mrb[12].mxu1 }
 0x313   : > { %v4084_v8 = vadd.f32 %v4974_v14, %v4399_v33  ;;  %v4045_v23 = vpop.f32.mrb[13].mxu1 }
 0x314   : > { %v4083_v39 = vadd.f32 %v4399_v33, %v4045_v23 }
 0x315   : > { %4093 = vst.msk [vmem:[%s224_s10 + $0x28] sm:$0xff] %vm4087_vm1, %v4084_v8 }
 0x316   : > { %4092 = vst.msk [vmem:[%s224_s10 + $0x20] sm:$0xff] %vm4087_vm1, %v4083_v39  ;;  %v4977_v30 = vpop.f32.mrb[14].mxu1 }
 0x317   : > { %v4086_v0 = vadd.f32 %v4977_v30, %v4399_v33  ;;  %v4055_v4 = vpop.f32.mrb[15].mxu1 }
 0x318   : > { %v4085_v34 = vadd.f32 %v4399_v33, %v4055_v4 }
 0x319   : > { %4095 = vst.msk [vmem:[%s224_s10 + $0x38] sm:$0xff] %vm4087_vm1, %v4086_v0 }
 0x31a   : > { %4094 = vst.msk [vmem:[%s224_s10 + $0x30] sm:$0xff] %vm4087_vm1, %v4085_v34 }
 0x31b PF: > { %s15_s18 = sadd.s32 1, %s5180_s18  }
 0x31c   : > { %p12_p4 = scmp.ge.s32.totalorder %s15_s18, 4  }
 0x31e   :  { %14 = sbr.rel (!%p12_p4) target bundleno = 1 (0x1), region = 95 }

</bundles_post_ra>
